<compile_context>
chip_gen: v7x
topology: tpu7x:2x2x1
jax: 0.10.0
libtpu: 0.0.40
codegen_flags: <defaults>
</compile_context>

<pallas_src>
import jax
import jax.numpy as jnp
import numpy as np
from jax.experimental import pallas as pl
from jax.experimental.pallas import tpu as pltpu

EMBED_DIM = 32
NUM_HEADS = 4
HEAD_DIM = EMBED_DIM // NUM_HEADS
FFN_DIM = 64
LN_EPS = 1e-5


# ----------------------------------------------------------------------------
# In-kernel helpers (traced inline; not separate pallas_calls)
# ----------------------------------------------------------------------------
def _layer_norm(z, gamma, beta):
    mean = jnp.mean(z, axis=-1, keepdims=True)
    c = z - mean
    var = jnp.mean(c * c, axis=-1, keepdims=True)
    return c * jax.lax.rsqrt(var + LN_EPS) * gamma + beta


def _heads_attention(qp, kp, vp, wo, mask_bias):
    """Multi-head attention given already-projected (and Q-pre-scaled) tensors.

    qp: (Lq, E)  kp, vp: (Lk, E)  wo: (E, E)  mask_bias: (1, Lk) or None.
    Returns (out (Lq, E) without out-proj bias, head-averaged attn (Lq, Lk)).
    Per-head context is accumulated directly into the E-wide output via
    p_h @ (V_h @ Wo_h) — no concatenate, lane-dense second matmul.
    """
    Lq = qp.shape[0]
    Lk = kp.shape[0]
    out = jnp.zeros((Lq, EMBED_DIM), jnp.float32)
    attn_sum = jnp.zeros((Lq, Lk), jnp.float32)
    for h in range(NUM_HEADS):                       # static unroll, H small
        lo = h * HEAD_DIM
        hi = lo + HEAD_DIM
        s = jax.lax.dot_general(
            qp[:, lo:hi], kp[:, lo:hi], (((1,), (1,)), ((), ())),
            preferred_element_type=jnp.float32)      # (Lq, Lk)
        if mask_bias is not None:
            s = s + mask_bias
        s = s - jnp.max(s, axis=-1, keepdims=True)
        p = jnp.exp(s)
        p = p / jnp.sum(p, axis=-1, keepdims=True)
        attn_sum = attn_sum + p
        vo_h = jnp.dot(vp[:, lo:hi], wo[lo:hi, :],
                       preferred_element_type=jnp.float32)   # (Lk, E)
        out = out + jnp.dot(p, vo_h, preferred_element_type=jnp.float32)
    return out, attn_sum * (1.0 / NUM_HEADS)


# ----------------------------------------------------------------------------
# Fused decoder-layer kernel (one batch element per grid step)
# ----------------------------------------------------------------------------
def _decoder_layer_kernel(
        q_ref, qpos_ref, k_ref, kpos_ref, v_ref, mask_ref,
        # self-attn weights (Q/K fused, Q pre-scaled)
        w_sa_qk_ref, b_sa_qk_ref, w_sa_v_ref, b_sa_v_ref, w_sa_o_ref, b_sa_o_ref,
        # cross-attn weights (Q pre-scaled)
        w_ca_q_ref, b_ca_q_ref, w_ca_k_ref, b_ca_k_ref,
        w_ca_v_ref, b_ca_v_ref, w_ca_o_ref, b_ca_o_ref,
        # FFN
        w1_ref, b1_ref, w2_ref, b2_ref,
        # LayerNorms
        g1_ref, be1_ref, g3_ref, be3_ref, g2_ref, be2_ref,
        # outputs
        out_ref, attn_ref):
    E = EMBED_DIM
    query = q_ref[0]        # (Lq, E)
    qpos = qpos_ref[0]      # (Lq, E)
    key = k_ref[0]          # (Lk, E)
    kpos = kpos_ref[0]      # (Lk, E)
    value = v_ref[0]        # (Lk, E)
    mask_bias = mask_ref[0]  # (1, Lk) additive (-1e9 where padded)

    # --- self attention: q = k = query + query_pos, value = query -----------
    sa_in = query + qpos
    qk = jnp.dot(sa_in, w_sa_qk_ref[...],
                 preferred_element_type=jnp.float32) + b_sa_qk_ref[...]  # (Lq, 2E)
    v_sa = jnp.dot(query, w_sa_v_ref[...],
                   preferred_element_type=jnp.float32) + b_sa_v_ref[...]
    sa_out, _ = _heads_attention(qk[:, :E], qk[:, E:], v_sa,
                                 w_sa_o_ref[...], None)
    sa_out = sa_out + b_sa_o_ref[...]
    x = _layer_norm(query + sa_out, g1_ref[...], be1_ref[...])

    # --- cross attention (residual base INCLUDES query_pos, as in reference) -
    q_ca = x + qpos
    k_ca = key + kpos
    qp = jnp.dot(q_ca, w_ca_q_ref[...],
                 preferred_element_type=jnp.float32) + b_ca_q_ref[...]
    kp = jnp.dot(k_ca, w_ca_k_ref[...],
                 preferred_element_type=jnp.float32) + b_ca_k_ref[...]
    vp = jnp.dot(value, w_ca_v_ref[...],
                 preferred_element_type=jnp.float32) + b_ca_v_ref[...]
    ca_out, attn = _heads_attention(qp, kp, vp, w_ca_o_ref[...], mask_bias)
    ca_out = ca_out + b_ca_o_ref[...]
    y = _layer_norm(q_ca + ca_out, g3_ref[...], be3_ref[...])

    # --- FFN + norm2 ---------------------------------------------------------
    h = jnp.maximum(jnp.dot(y, w1_ref[...],
                            preferred_element_type=jnp.float32) + b1_ref[...], 0.0)
    y2 = jnp.dot(h, w2_ref[...],
                 preferred_element_type=jnp.float32) + b2_ref[...]
    out = _layer_norm(y + y2, g2_ref[...], be2_ref[...])

    out_ref[0] = out
    attn_ref[0] = attn


# ----------------------------------------------------------------------------
# Full layer wrapper (matches TransformerDecoderLayer.forward, dropout = id)
# ----------------------------------------------------------------------------
def transformer_decoder_layer(params, query, key_t, value, key_pos, query_pos,
                              key_padding_mask):
    Lq, N, E = query.shape
    Lk = key_t.shape[0]

    # batch-first glue (tiny tensors; keeps block last-2-dims == array dims)
    qb = jnp.transpose(query, (1, 0, 2))       # (N, Lq, E)
    kb = jnp.transpose(key_t, (1, 0, 2))       # (N, Lk, E)
    vb = jnp.transpose(value, (1, 0, 2))
    qpos = jnp.transpose(query_pos, (1, 0, 2))
    kpos = jnp.transpose(key_pos, (1, 0, 2))

    # (N, 1, Lk) additive bias; broadcast over Lq happens inside the kernel
    mask_bias = jnp.where(key_padding_mask, -1e9, 0.0).astype(jnp.float32)[:, None, :]

    scale = 1.0 / (HEAD_DIM ** 0.5)

    # self-attn: fuse Q/K projections (shared input) and fold softmax scale
    wq_s, bq_s, wk_s, bk_s, wv_s, bv_s, wo_s, bo_s = params["self_attn"]
    w_sa_qk = jnp.concatenate([wq_s * scale, wk_s], axis=1)   # (E, 2E)
    b_sa_qk = jnp.concatenate([bq_s * scale, bk_s], axis=1)   # (1, 2E)

    # cross-attn: fold softmax scale into Wq/bq
    wq_c, bq_c, wk_c, bk_c, wv_c, bv_c, wo_c, bo_c = params["cross_attn"]
    wq_c = wq_c * scale
    bq_c = bq_c * scale

    w1, b1f, w2, b2f = params["ffn"]
    g1, be1 = params["norm1"]
    g2, be2 = params["norm2"]
    g3, be3 = params["norm3"]

    weight_args = (w_sa_qk, b_sa_qk, wv_s, bv_s, wo_s, bo_s,
                   wq_c, bq_c, wk_c, bk_c, wv_c, bv_c, wo_c, bo_c,
                   w1, b1f, w2, b2f,
                   g1, be1, g3, be3, g2, be2)

    def batch_spec(L):
        return pl.BlockSpec((1, L, E), lambda b: (b, 0, 0))

    def const_spec(a):
        nd = a.ndim
        return pl.BlockSpec(a.shape, lambda b, _nd=nd: (0,) * _nd)

    in_specs = ([batch_spec(Lq), batch_spec(Lq), batch_spec(Lk), batch_spec(Lk),
                 batch_spec(Lk), pl.BlockSpec((1, 1, Lk), lambda b: (b, 0, 0))]
                + [const_spec(a) for a in weight_args])

    out, attn_map = pl.pallas_call(
        _decoder_layer_kernel,
        grid=(N,),
        in_specs=in_specs,
        out_specs=(pl.BlockSpec((1, Lq, E), lambda b: (b, 0, 0)),
                   pl.BlockSpec((1, Lq, Lk), lambda b: (b, 0, 0))),
        out_shape=(jax.ShapeDtypeStruct((N, Lq, E), jnp.float32),
                   jax.ShapeDtypeStruct((N, Lq, Lk), jnp.float32)),
        compiler_params=pltpu.CompilerParams(dimension_semantics=("parallel",)),
    )(qb, qpos, kb, kpos, vb, mask_bias, *weight_args)

    return jnp.transpose(out, (1, 0, 2)), attn_map   # (Lq, N, E), (N, Lq, Lk)


# ----------------------------------------------------------------------------
# Pure-JAX reference (same parameter layout) for correctness check
# ----------------------------------------------------------------------------
def _ln_ref(z, gamma, beta):
    mean = z.mean(-1, keepdims=True)
    c = z - mean
    var = (c * c).mean(-1, keepdims=True)
    return c * jax.lax.rsqrt(var + LN_EPS) * gamma + beta


def _mha_ref(q, k, v, add_mask, attn_params):
    wq, bq, wk, bk, wv, bv, wo, bo = attn_params
    hp = jax.lax.Precision.HIGHEST
    qp = jnp.einsum("nle,ef->nlf", q, wq, precision=hp) + bq
    kp = jnp.einsum("nle,ef->nlf", k, wk, precision=hp) + bk
    vp = jnp.einsum("nle,ef->nlf", v, wv, precision=hp) + bv
    N, Lq, E = qp.shape
    Lk = kp.shape[1]
    qh = qp.reshape(N, Lq, NUM_HEADS, HEAD_DIM)
    kh = kp.reshape(N, Lk, NUM_HEADS, HEAD_DIM)
    vh = vp.reshape(N, Lk, NUM_HEADS, HEAD_DIM)
    scores = jnp.einsum("nqhd,nkhd->nhqk", qh, kh, precision=hp) / (HEAD_DIM ** 0.5)
    scores = scores + add_mask[:, None, :, :]
    p = jax.nn.softmax(scores, axis=-1)
    ctx = jnp.einsum("nhqk,nkhd->nqhd", p, vh, precision=hp).reshape(N, Lq, E)
    out = jnp.einsum("nle,ef->nlf", ctx, wo, precision=hp) + bo
    return out, p.mean(axis=1)


def transformer_decoder_layer_ref(params, query, key_t, value, key_pos, query_pos,
                                  key_padding_mask):
    hp = jax.lax.Precision.HIGHEST
    Lq, N, E = query.shape
    Lk = key_t.shape[0]
    qb = jnp.transpose(query, (1, 0, 2))
    kb = jnp.transpose(key_t, (1, 0, 2))
    vb = jnp.transpose(value, (1, 0, 2))
    qpos = jnp.transpose(query_pos, (1, 0, 2))
    kpos = jnp.transpose(key_pos, (1, 0, 2))

    sa_in = qb + qpos
    sa_out, _ = _mha_ref(sa_in, sa_in, qb, jnp.zeros((N, Lq, Lq), jnp.float32),
                         params["self_attn"])
    g1, b1 = params["norm1"]
    x = _ln_ref(qb + sa_out, g1, b1)

    add_mask = jnp.where(key_padding_mask[:, None, :], -1e9, 0.0).astype(jnp.float32)
    add_mask = jnp.broadcast_to(add_mask, (N, Lq, Lk))
    q_ca = x + qpos
    k_ca = kb + kpos
    ca_out, attn_map = _mha_ref(q_ca, k_ca, vb, add_mask, params["cross_attn"])
    g3, b3 = params["norm3"]
    y = _ln_ref(q_ca + ca_out, g3, b3)

    w1, bb1, w2, bb2 = params["ffn"]
    h = jnp.maximum(jnp.einsum("nle,ef->nlf", y, w1, precision=hp) + bb1, 0.0)
    y2 = jnp.einsum("nlf,fe->nle", h, w2, precision=hp) + bb2
    g2, b2 = params["norm2"]
    out = _ln_ref(y + y2, g2, b2)
    return jnp.transpose(out, (1, 0, 2)), attn_map


# ----------------------------------------------------------------------------
# Deterministic parameter init (weights stored as (in, out), biases as (1, out))
# ----------------------------------------------------------------------------
def init_params(rng):
    ks = jax.random.split(rng, 3)

    def attn_params(k):
        kk = jax.random.split(k, 8)

        def lin(kw, kb, n_in, n_out):
            w = 0.05 * jax.random.normal(kw, (n_in, n_out), jnp.float32)
            b = 0.02 * jax.random.normal(kb, (1, n_out), jnp.float32)
            return w, b

        wq, bq = lin(kk[0], kk[1], EMBED_DIM, EMBED_DIM)
        wk, bk = lin(kk[2], kk[3], EMBED_DIM, EMBED_DIM)
        wv, bv = lin(kk[4], kk[5], EMBED_DIM, EMBED_DIM)
        wo, bo = lin(kk[6], kk[7], EMBED_DIM, EMBED_DIM)
        return (wq, bq, wk, bk, wv, bv, wo, bo)

    def ln_params():
        return (jnp.ones((1, EMBED_DIM), jnp.float32),
                jnp.zeros((1, EMBED_DIM), jnp.float32))

    kf = jax.random.split(ks[2], 4)
    w1 = 0.05 * jax.random.normal(kf[0], (EMBED_DIM, FFN_DIM), jnp.float32)
    b1 = 0.02 * jax.random.normal(kf[1], (1, FFN_DIM), jnp.float32)
    w2 = 0.05 * jax.random.normal(kf[2], (FFN_DIM, EMBED_DIM), jnp.float32)
    b2 = 0.02 * jax.random.normal(kf[3], (1, EMBED_DIM), jnp.float32)

    return {
        "self_attn": attn_params(ks[0]),
        "cross_attn": attn_params(ks[1]),
        "ffn": (w1, b1, w2, b2),
        "norm1": ln_params(),
        "norm2": ln_params(),
        "norm3": ln_params(),
    }


if __name__ == "__main__":
    rng = jax.random.PRNGKey(0)
    Lq, Lk, N = 8, 16, 2
    k_q, k_k, k_v, k_kp, k_qp, k_par = jax.random.split(rng, 6)

    query = jax.random.normal(k_q, (Lq, N, EMBED_DIM), jnp.float32)
    key_t = jax.random.normal(k_k, (Lk, N, EMBED_DIM), jnp.float32)
    value = jax.random.normal(k_v, (Lk, N, EMBED_DIM), jnp.float32)
    key_pos = jax.random.normal(k_kp, (Lk, N, EMBED_DIM), jnp.float32)
    query_pos = jax.random.normal(k_qp, (Lq, N, EMBED_DIM), jnp.float32)
    # mask out the last 3 key positions of batch element 1 (True = ignore)
    key_padding_mask = jnp.zeros((N, Lk), jnp.bool_).at[1, -3:].set(True)

    params = init_params(k_par)

    out, attn_map = transformer_decoder_layer(
        params, query, key_t, value, key_pos, query_pos, key_padding_mask)
    jax.block_until_ready((out, attn_map))

    out_ref, attn_ref = transformer_decoder_layer_ref(
        params, query, key_t, value, key_pos, query_pos, key_padding_mask)

    assert out.shape == (Lq, N, EMBED_DIM)
    assert attn_map.shape == (N, Lq, Lk)
    assert np.allclose(np.asarray(out), np.asarray(out_ref), atol=2e-2, rtol=2e-2)
    assert np.allclose(np.asarray(attn_map), np.asarray(attn_ref), atol=2e-2, rtol=2e-2)
    print("KERNEL_OK")
</pallas_src>

<mosaic_0001>
module attributes {stable_mosaic.version = 11 : i64} {
  func.func @_decoder_layer_kernel(%arg0: i32, %arg1: memref<1x8x32xf32, #tpu.memory_space<vmem>>, %arg2: memref<1x8x32xf32, #tpu.memory_space<vmem>>, %arg3: memref<1x16x32xf32, #tpu.memory_space<vmem>>, %arg4: memref<1x16x32xf32, #tpu.memory_space<vmem>>, %arg5: memref<1x16x32xf32, #tpu.memory_space<vmem>>, %arg6: memref<1x1x16xf32, #tpu.memory_space<vmem>>, %arg7: memref<32x64xf32, #tpu.memory_space<vmem>>, %arg8: memref<1x64xf32, #tpu.memory_space<vmem>>, %arg9: memref<32x32xf32, #tpu.memory_space<vmem>>, %arg10: memref<1x32xf32, #tpu.memory_space<vmem>>, %arg11: memref<32x32xf32, #tpu.memory_space<vmem>>, %arg12: memref<1x32xf32, #tpu.memory_space<vmem>>, %arg13: memref<32x32xf32, #tpu.memory_space<vmem>>, %arg14: memref<1x32xf32, #tpu.memory_space<vmem>>, %arg15: memref<32x32xf32, #tpu.memory_space<vmem>>, %arg16: memref<1x32xf32, #tpu.memory_space<vmem>>, %arg17: memref<32x32xf32, #tpu.memory_space<vmem>>, %arg18: memref<1x32xf32, #tpu.memory_space<vmem>>, %arg19: memref<32x32xf32, #tpu.memory_space<vmem>>, %arg20: memref<1x32xf32, #tpu.memory_space<vmem>>, %arg21: memref<32x64xf32, #tpu.memory_space<vmem>>, %arg22: memref<1x64xf32, #tpu.memory_space<vmem>>, %arg23: memref<64x32xf32, #tpu.memory_space<vmem>>, %arg24: memref<1x32xf32, #tpu.memory_space<vmem>>, %arg25: memref<1x32xf32, #tpu.memory_space<vmem>>, %arg26: memref<1x32xf32, #tpu.memory_space<vmem>>, %arg27: memref<1x32xf32, #tpu.memory_space<vmem>>, %arg28: memref<1x32xf32, #tpu.memory_space<vmem>>, %arg29: memref<1x32xf32, #tpu.memory_space<vmem>>, %arg30: memref<1x32xf32, #tpu.memory_space<vmem>>, %arg31: memref<1x8x32xf32, #tpu.memory_space<vmem>>, %arg32: memref<1x8x16xf32, #tpu.memory_space<vmem>>) attributes {dimension_semantics = [#tpu.dimension_semantics<parallel>], iteration_bounds = array<i64: 2>, scalar_prefetch = 0 : i64, scratch_operands = 0 : i64, tpu.core_type = #tpu.core_type<tc>, window_params = [{transform_indices = @transform_0, window_bounds = array<i64: 1, 8, 32>}, {transform_indices = @transform_1, window_bounds = array<i64: 1, 8, 32>}, {transform_indices = @transform_2, window_bounds = array<i64: 1, 16, 32>}, {transform_indices = @transform_3, window_bounds = array<i64: 1, 16, 32>}, {transform_indices = @transform_4, window_bounds = array<i64: 1, 16, 32>}, {transform_indices = @transform_5, window_bounds = array<i64: 1, 1, 16>}, {pipeline_mode = #tpu.pipeline_mode<synchronous>, transform_indices = @transform_6, window_bounds = array<i64: 32, 64>}, {pipeline_mode = #tpu.pipeline_mode<synchronous>, transform_indices = @transform_7, window_bounds = array<i64: 1, 64>}, {pipeline_mode = #tpu.pipeline_mode<synchronous>, transform_indices = @transform_8, window_bounds = array<i64: 32, 32>}, {pipeline_mode = #tpu.pipeline_mode<synchronous>, transform_indices = @transform_9, window_bounds = array<i64: 1, 32>}, {pipeline_mode = #tpu.pipeline_mode<synchronous>, transform_indices = @transform_10, window_bounds = array<i64: 32, 32>}, {pipeline_mode = #tpu.pipeline_mode<synchronous>, transform_indices = @transform_11, window_bounds = array<i64: 1, 32>}, {pipeline_mode = #tpu.pipeline_mode<synchronous>, transform_indices = @transform_12, window_bounds = array<i64: 32, 32>}, {pipeline_mode = #tpu.pipeline_mode<synchronous>, transform_indices = @transform_13, window_bounds = array<i64: 1, 32>}, {pipeline_mode = #tpu.pipeline_mode<synchronous>, transform_indices = @transform_14, window_bounds = array<i64: 32, 32>}, {pipeline_mode = #tpu.pipeline_mode<synchronous>, transform_indices = @transform_15, window_bounds = array<i64: 1, 32>}, {pipeline_mode = #tpu.pipeline_mode<synchronous>, transform_indices = @transform_16, window_bounds = array<i64: 32, 32>}, {pipeline_mode = #tpu.pipeline_mode<synchronous>, transform_indices = @transform_17, window_bounds = array<i64: 1, 32>}, {pipeline_mode = #tpu.pipeline_mode<synchronous>, transform_indices = @transform_18, window_bounds = array<i64: 32, 32>}, {pipeline_mode = #tpu.pipeline_mode<synchronous>, transform_indices = @transform_19, window_bounds = array<i64: 1, 32>}, {pipeline_mode = #tpu.pipeline_mode<synchronous>, transform_indices = @transform_20, window_bounds = array<i64: 32, 64>}, {pipeline_mode = #tpu.pipeline_mode<synchronous>, transform_indices = @transform_21, window_bounds = array<i64: 1, 64>}, {pipeline_mode = #tpu.pipeline_mode<synchronous>, transform_indices = @transform_22, window_bounds = array<i64: 64, 32>}, {pipeline_mode = #tpu.pipeline_mode<synchronous>, transform_indices = @transform_23, window_bounds = array<i64: 1, 32>}, {pipeline_mode = #tpu.pipeline_mode<synchronous>, transform_indices = @transform_24, window_bounds = array<i64: 1, 32>}, {pipeline_mode = #tpu.pipeline_mode<synchronous>, transform_indices = @transform_25, window_bounds = array<i64: 1, 32>}, {pipeline_mode = #tpu.pipeline_mode<synchronous>, transform_indices = @transform_26, window_bounds = array<i64: 1, 32>}, {pipeline_mode = #tpu.pipeline_mode<synchronous>, transform_indices = @transform_27, window_bounds = array<i64: 1, 32>}, {pipeline_mode = #tpu.pipeline_mode<synchronous>, transform_indices = @transform_28, window_bounds = array<i64: 1, 32>}, {pipeline_mode = #tpu.pipeline_mode<synchronous>, transform_indices = @transform_29, window_bounds = array<i64: 1, 32>}, {transform_indices = @transform_30, window_bounds = array<i64: 1, 8, 32>}, {transform_indices = @transform_31, window_bounds = array<i64: 1, 8, 16>}]} {
    %c0 = arith.constant 0 : index
    %c0_0 = arith.constant 0 : index
    %c0_1 = arith.constant 0 : index
    %0 = vector.load %arg1[%c0, %c0_0, %c0_1] : memref<1x8x32xf32, #tpu.memory_space<vmem>>, vector<1x8x32xf32>
    %1 = vector.shape_cast %0 : vector<1x8x32xf32> to vector<8x32xf32>
    %c0_2 = arith.constant 0 : index
    %c0_3 = arith.constant 0 : index
    %c0_4 = arith.constant 0 : index
    %2 = vector.load %arg2[%c0_2, %c0_3, %c0_4] : memref<1x8x32xf32, #tpu.memory_space<vmem>>, vector<1x8x32xf32>
    %3 = vector.shape_cast %2 : vector<1x8x32xf32> to vector<8x32xf32>
    %c0_5 = arith.constant 0 : index
    %c0_6 = arith.constant 0 : index
    %c0_7 = arith.constant 0 : index
    %4 = vector.load %arg3[%c0_5, %c0_6, %c0_7] : memref<1x16x32xf32, #tpu.memory_space<vmem>>, vector<1x16x32xf32>
    %5 = vector.shape_cast %4 : vector<1x16x32xf32> to vector<16x32xf32>
    %c0_8 = arith.constant 0 : index
    %c0_9 = arith.constant 0 : index
    %c0_10 = arith.constant 0 : index
    %6 = vector.load %arg4[%c0_8, %c0_9, %c0_10] : memref<1x16x32xf32, #tpu.memory_space<vmem>>, vector<1x16x32xf32>
    %7 = vector.shape_cast %6 : vector<1x16x32xf32> to vector<16x32xf32>
    %c0_11 = arith.constant 0 : index
    %c0_12 = arith.constant 0 : index
    %c0_13 = arith.constant 0 : index
    %8 = vector.load %arg5[%c0_11, %c0_12, %c0_13] : memref<1x16x32xf32, #tpu.memory_space<vmem>>, vector<1x16x32xf32>
    %9 = vector.shape_cast %8 : vector<1x16x32xf32> to vector<16x32xf32>
    %c0_14 = arith.constant 0 : index
    %c0_15 = arith.constant 0 : index
    %c0_16 = arith.constant 0 : index
    %10 = vector.load %arg6[%c0_14, %c0_15, %c0_16] : memref<1x1x16xf32, #tpu.memory_space<vmem>>, vector<1x1x16xf32>
    %11 = vector.shape_cast %10 : vector<1x1x16xf32> to vector<1x16xf32>
    %12 = arith.addf %1, %3 : vector<8x32xf32>
    %c0_17 = arith.constant 0 : index
    %c0_18 = arith.constant 0 : index
    %13 = vector.load %arg7[%c0_17, %c0_18] : memref<32x64xf32, #tpu.memory_space<vmem>>, vector<32x64xf32>
    %cst = arith.constant dense<0.000000e+00> : vector<8x64xf32>
    %14 = tpu.matmul %12, %13, %cst {dimension_numbers = #tpu.dot_dimension_numbers<[1], [0], [0], [1], [0, 0, 1, 1], [], []>} : vector<8x32xf32>, vector<32x64xf32>, vector<8x64xf32> -> vector<8x64xf32>
    %c0_19 = arith.constant 0 : index
    %c0_20 = arith.constant 0 : index
    %15 = vector.load %arg8[%c0_19, %c0_20] : memref<1x64xf32, #tpu.memory_space<vmem>>, vector<1x64xf32>
    %16 = vector.broadcast %15 : vector<1x64xf32> to vector<8x64xf32>
    %17 = arith.addf %14, %16 : vector<8x64xf32>
    %c0_21 = arith.constant 0 : index
    %c0_22 = arith.constant 0 : index
    %18 = vector.load %arg9[%c0_21, %c0_22] : memref<32x32xf32, #tpu.memory_space<vmem>>, vector<32x32xf32>
    %cst_23 = arith.constant dense<0.000000e+00> : vector<8x32xf32>
    %19 = tpu.matmul %1, %18, %cst_23 {dimension_numbers = #tpu.dot_dimension_numbers<[1], [0], [0], [1], [0, 0, 1, 1], [], []>} : vector<8x32xf32>, vector<32x32xf32>, vector<8x32xf32> -> vector<8x32xf32>
    %c0_24 = arith.constant 0 : index
    %c0_25 = arith.constant 0 : index
    %20 = vector.load %arg10[%c0_24, %c0_25] : memref<1x32xf32, #tpu.memory_space<vmem>>, vector<1x32xf32>
    %21 = vector.broadcast %20 : vector<1x32xf32> to vector<8x32xf32>
    %22 = arith.addf %19, %21 : vector<8x32xf32>
    %23 = vector.extract_strided_slice %17 {offsets = [0, 0], sizes = [8, 32], strides = [1, 1]} : vector<8x64xf32> to vector<8x32xf32>
    %24 = vector.extract_strided_slice %17 {offsets = [0, 32], sizes = [8, 32], strides = [1, 1]} : vector<8x64xf32> to vector<8x32xf32>
    %c0_26 = arith.constant 0 : index
    %c0_27 = arith.constant 0 : index
    %25 = vector.load %arg11[%c0_26, %c0_27] : memref<32x32xf32, #tpu.memory_space<vmem>>, vector<32x32xf32>
    %cst_28 = arith.constant 0.000000e+00 : f32
    %26 = vector.broadcast %cst_28 : f32 to vector<8x32xf32>
    %27 = vector.extract_strided_slice %23 {offsets = [0, 0], sizes = [8, 8], strides = [1, 1]} : vector<8x32xf32> to vector<8x8xf32>
    %28 = vector.extract_strided_slice %24 {offsets = [0, 0], sizes = [8, 8], strides = [1, 1]} : vector<8x32xf32> to vector<8x8xf32>
    %cst_29 = arith.constant dense<0.000000e+00> : vector<8x8xf32>
    %29 = tpu.matmul %27, %28, %cst_29 {dimension_numbers = #tpu.dot_dimension_numbers<[1], [1], [0], [0], [0, 0, 1, 0], [], []>} : vector<8x8xf32>, vector<8x8xf32>, vector<8x8xf32> -> vector<8x8xf32>
    %cst_30 = arith.constant dense<0xFF800000> : vector<8xf32>
    %30 = vector.multi_reduction <maximumf>, %29, %cst_30 [1] : vector<8x8xf32> to vector<8xf32>
    %31 = vector.shape_cast %30 : vector<8xf32> to vector<8x1xf32>
    %32 = vector.broadcast %31 : vector<8x1xf32> to vector<8x8xf32>
    %33 = arith.subf %29, %32 : vector<8x8xf32>
    %34 = math.exp %33 : vector<8x8xf32>
    %cst_31 = arith.constant dense<0.000000e+00> : vector<8xf32>
    %35 = vector.multi_reduction <add>, %34, %cst_31 [1] : vector<8x8xf32> to vector<8xf32>
    %36 = vector.shape_cast %35 : vector<8xf32> to vector<8x1xf32>
    %37 = vector.broadcast %36 : vector<8x1xf32> to vector<8x8xf32>
    %38 = arith.divf %34, %37 : vector<8x8xf32>
    %39 = vector.extract_strided_slice %22 {offsets = [0, 0], sizes = [8, 8], strides = [1, 1]} : vector<8x32xf32> to vector<8x8xf32>
    %40 = vector.extract_strided_slice %25 {offsets = [0, 0], sizes = [8, 32], strides = [1, 1]} : vector<32x32xf32> to vector<8x32xf32>
    %cst_32 = arith.constant dense<0.000000e+00> : vector<8x32xf32>
    %41 = tpu.matmul %39, %40, %cst_32 {dimension_numbers = #tpu.dot_dimension_numbers<[1], [0], [0], [1], [0, 0, 1, 1], [], []>} : vector<8x8xf32>, vector<8x32xf32>, vector<8x32xf32> -> vector<8x32xf32>
    %cst_33 = arith.constant dense<0.000000e+00> : vector<8x32xf32>
    %42 = tpu.matmul %38, %41, %cst_33 {dimension_numbers = #tpu.dot_dimension_numbers<[1], [0], [0], [1], [0, 0, 1, 1], [], []>} : vector<8x8xf32>, vector<8x32xf32>, vector<8x32xf32> -> vector<8x32xf32>
    %43 = arith.addf %26, %42 : vector<8x32xf32>
    %44 = vector.extract_strided_slice %23 {offsets = [0, 8], sizes = [8, 8], strides = [1, 1]} : vector<8x32xf32> to vector<8x8xf32>
    %45 = vector.extract_strided_slice %24 {offsets = [0, 8], sizes = [8, 8], strides = [1, 1]} : vector<8x32xf32> to vector<8x8xf32>
    %cst_34 = arith.constant dense<0.000000e+00> : vector<8x8xf32>
    %46 = tpu.matmul %44, %45, %cst_34 {dimension_numbers = #tpu.dot_dimension_numbers<[1], [1], [0], [0], [0, 0, 1, 0], [], []>} : vector<8x8xf32>, vector<8x8xf32>, vector<8x8xf32> -> vector<8x8xf32>
    %cst_35 = arith.constant dense<0xFF800000> : vector<8xf32>
    %47 = vector.multi_reduction <maximumf>, %46, %cst_35 [1] : vector<8x8xf32> to vector<8xf32>
    %48 = vector.shape_cast %47 : vector<8xf32> to vector<8x1xf32>
    %49 = vector.broadcast %48 : vector<8x1xf32> to vector<8x8xf32>
    %50 = arith.subf %46, %49 : vector<8x8xf32>
    %51 = math.exp %50 : vector<8x8xf32>
    %cst_36 = arith.constant dense<0.000000e+00> : vector<8xf32>
    %52 = vector.multi_reduction <add>, %51, %cst_36 [1] : vector<8x8xf32> to vector<8xf32>
    %53 = vector.shape_cast %52 : vector<8xf32> to vector<8x1xf32>
    %54 = vector.broadcast %53 : vector<8x1xf32> to vector<8x8xf32>
    %55 = arith.divf %51, %54 : vector<8x8xf32>
    %56 = vector.extract_strided_slice %22 {offsets = [0, 8], sizes = [8, 8], strides = [1, 1]} : vector<8x32xf32> to vector<8x8xf32>
    %57 = vector.extract_strided_slice %25 {offsets = [8, 0], sizes = [8, 32], strides = [1, 1]} : vector<32x32xf32> to vector<8x32xf32>
    %cst_37 = arith.constant dense<0.000000e+00> : vector<8x32xf32>
    %58 = tpu.matmul %56, %57, %cst_37 {dimension_numbers = #tpu.dot_dimension_numbers<[1], [0], [0], [1], [0, 0, 1, 1], [], []>} : vector<8x8xf32>, vector<8x32xf32>, vector<8x32xf32> -> vector<8x32xf32>
    %cst_38 = arith.constant dense<0.000000e+00> : vector<8x32xf32>
    %59 = tpu.matmul %55, %58, %cst_38 {dimension_numbers = #tpu.dot_dimension_numbers<[1], [0], [0], [1], [0, 0, 1, 1], [], []>} : vector<8x8xf32>, vector<8x32xf32>, vector<8x32xf32> -> vector<8x32xf32>
    %60 = arith.addf %43, %59 : vector<8x32xf32>
    %61 = vector.extract_strided_slice %23 {offsets = [0, 16], sizes = [8, 8], strides = [1, 1]} : vector<8x32xf32> to vector<8x8xf32>
    %62 = vector.extract_strided_slice %24 {offsets = [0, 16], sizes = [8, 8], strides = [1, 1]} : vector<8x32xf32> to vector<8x8xf32>
    %cst_39 = arith.constant dense<0.000000e+00> : vector<8x8xf32>
    %63 = tpu.matmul %61, %62, %cst_39 {dimension_numbers = #tpu.dot_dimension_numbers<[1], [1], [0], [0], [0, 0, 1, 0], [], []>} : vector<8x8xf32>, vector<8x8xf32>, vector<8x8xf32> -> vector<8x8xf32>
    %cst_40 = arith.constant dense<0xFF800000> : vector<8xf32>
    %64 = vector.multi_reduction <maximumf>, %63, %cst_40 [1] : vector<8x8xf32> to vector<8xf32>
    %65 = vector.shape_cast %64 : vector<8xf32> to vector<8x1xf32>
    %66 = vector.broadcast %65 : vector<8x1xf32> to vector<8x8xf32>
    %67 = arith.subf %63, %66 : vector<8x8xf32>
    %68 = math.exp %67 : vector<8x8xf32>
    %cst_41 = arith.constant dense<0.000000e+00> : vector<8xf32>
    %69 = vector.multi_reduction <add>, %68, %cst_41 [1] : vector<8x8xf32> to vector<8xf32>
    %70 = vector.shape_cast %69 : vector<8xf32> to vector<8x1xf32>
    %71 = vector.broadcast %70 : vector<8x1xf32> to vector<8x8xf32>
    %72 = arith.divf %68, %71 : vector<8x8xf32>
    %73 = vector.extract_strided_slice %22 {offsets = [0, 16], sizes = [8, 8], strides = [1, 1]} : vector<8x32xf32> to vector<8x8xf32>
    %74 = vector.extract_strided_slice %25 {offsets = [16, 0], sizes = [8, 32], strides = [1, 1]} : vector<32x32xf32> to vector<8x32xf32>
    %cst_42 = arith.constant dense<0.000000e+00> : vector<8x32xf32>
    %75 = tpu.matmul %73, %74, %cst_42 {dimension_numbers = #tpu.dot_dimension_numbers<[1], [0], [0], [1], [0, 0, 1, 1], [], []>} : vector<8x8xf32>, vector<8x32xf32>, vector<8x32xf32> -> vector<8x32xf32>
    %cst_43 = arith.constant dense<0.000000e+00> : vector<8x32xf32>
    %76 = tpu.matmul %72, %75, %cst_43 {dimension_numbers = #tpu.dot_dimension_numbers<[1], [0], [0], [1], [0, 0, 1, 1], [], []>} : vector<8x8xf32>, vector<8x32xf32>, vector<8x32xf32> -> vector<8x32xf32>
    %77 = arith.addf %60, %76 : vector<8x32xf32>
    %78 = vector.extract_strided_slice %23 {offsets = [0, 24], sizes = [8, 8], strides = [1, 1]} : vector<8x32xf32> to vector<8x8xf32>
    %79 = vector.extract_strided_slice %24 {offsets = [0, 24], sizes = [8, 8], strides = [1, 1]} : vector<8x32xf32> to vector<8x8xf32>
    %cst_44 = arith.constant dense<0.000000e+00> : vector<8x8xf32>
    %80 = tpu.matmul %78, %79, %cst_44 {dimension_numbers = #tpu.dot_dimension_numbers<[1], [1], [0], [0], [0, 0, 1, 0], [], []>} : vector<8x8xf32>, vector<8x8xf32>, vector<8x8xf32> -> vector<8x8xf32>
    %cst_45 = arith.constant dense<0xFF800000> : vector<8xf32>
    %81 = vector.multi_reduction <maximumf>, %80, %cst_45 [1] : vector<8x8xf32> to vector<8xf32>
    %82 = vector.shape_cast %81 : vector<8xf32> to vector<8x1xf32>
    %83 = vector.broadcast %82 : vector<8x1xf32> to vector<8x8xf32>
    %84 = arith.subf %80, %83 : vector<8x8xf32>
    %85 = math.exp %84 : vector<8x8xf32>
    %cst_46 = arith.constant dense<0.000000e+00> : vector<8xf32>
    %86 = vector.multi_reduction <add>, %85, %cst_46 [1] : vector<8x8xf32> to vector<8xf32>
    %87 = vector.shape_cast %86 : vector<8xf32> to vector<8x1xf32>
    %88 = vector.broadcast %87 : vector<8x1xf32> to vector<8x8xf32>
    %89 = arith.divf %85, %88 : vector<8x8xf32>
    %90 = vector.extract_strided_slice %22 {offsets = [0, 24], sizes = [8, 8], strides = [1, 1]} : vector<8x32xf32> to vector<8x8xf32>
    %91 = vector.extract_strided_slice %25 {offsets = [24, 0], sizes = [8, 32], strides = [1, 1]} : vector<32x32xf32> to vector<8x32xf32>
    %cst_47 = arith.constant dense<0.000000e+00> : vector<8x32xf32>
    %92 = tpu.matmul %90, %91, %cst_47 {dimension_numbers = #tpu.dot_dimension_numbers<[1], [0], [0], [1], [0, 0, 1, 1], [], []>} : vector<8x8xf32>, vector<8x32xf32>, vector<8x32xf32> -> vector<8x32xf32>
    %cst_48 = arith.constant dense<0.000000e+00> : vector<8x32xf32>
    %93 = tpu.matmul %89, %92, %cst_48 {dimension_numbers = #tpu.dot_dimension_numbers<[1], [0], [0], [1], [0, 0, 1, 1], [], []>} : vector<8x8xf32>, vector<8x32xf32>, vector<8x32xf32> -> vector<8x32xf32>
    %94 = arith.addf %77, %93 : vector<8x32xf32>
    %c0_49 = arith.constant 0 : index
    %c0_50 = arith.constant 0 : index
    %95 = vector.load %arg12[%c0_49, %c0_50] : memref<1x32xf32, #tpu.memory_space<vmem>>, vector<1x32xf32>
    %96 = vector.broadcast %95 : vector<1x32xf32> to vector<8x32xf32>
    %97 = arith.addf %94, %96 : vector<8x32xf32>
    %98 = arith.addf %1, %97 : vector<8x32xf32>
    %c0_51 = arith.constant 0 : index
    %c0_52 = arith.constant 0 : index
    %99 = vector.load %arg25[%c0_51, %c0_52] : memref<1x32xf32, #tpu.memory_space<vmem>>, vector<1x32xf32>
    %c0_53 = arith.constant 0 : index
    %c0_54 = arith.constant 0 : index
    %100 = vector.load %arg26[%c0_53, %c0_54] : memref<1x32xf32, #tpu.memory_space<vmem>>, vector<1x32xf32>
    %cst_55 = arith.constant dense<0.000000e+00> : vector<8xf32>
    %101 = vector.multi_reduction <add>, %98, %cst_55 [1] : vector<8x32xf32> to vector<8xf32>
    %102 = vector.shape_cast %101 : vector<8xf32> to vector<8x1xf32>
    %cst_56 = arith.constant 3.200000e+01 : f32
    %103 = vector.broadcast %cst_56 : f32 to vector<8x1xf32>
    %104 = arith.divf %102, %103 : vector<8x1xf32>
    %105 = vector.broadcast %104 : vector<8x1xf32> to vector<8x32xf32>
    %106 = arith.subf %98, %105 : vector<8x32xf32>
    %107 = arith.mulf %106, %106 : vector<8x32xf32>
    %cst_57 = arith.constant dense<0.000000e+00> : vector<8xf32>
    %108 = vector.multi_reduction <add>, %107, %cst_57 [1] : vector<8x32xf32> to vector<8xf32>
    %109 = vector.shape_cast %108 : vector<8xf32> to vector<8x1xf32>
    %cst_58 = arith.constant 3.200000e+01 : f32
    %110 = vector.broadcast %cst_58 : f32 to vector<8x1xf32>
    %111 = arith.divf %109, %110 : vector<8x1xf32>
    %cst_59 = arith.constant 9.99999974E-6 : f32
    %112 = vector.broadcast %cst_59 : f32 to vector<8x1xf32>
    %113 = arith.addf %111, %112 : vector<8x1xf32>
    %114 = math.rsqrt %113 : vector<8x1xf32>
    %115 = vector.broadcast %114 : vector<8x1xf32> to vector<8x32xf32>
    %116 = arith.mulf %106, %115 : vector<8x32xf32>
    %117 = vector.broadcast %99 : vector<1x32xf32> to vector<8x32xf32>
    %118 = arith.mulf %116, %117 : vector<8x32xf32>
    %119 = vector.broadcast %100 : vector<1x32xf32> to vector<8x32xf32>
    %120 = arith.addf %118, %119 : vector<8x32xf32>
    %121 = arith.addf %120, %3 : vector<8x32xf32>
    %122 = arith.addf %5, %7 : vector<16x32xf32>
    %c0_60 = arith.constant 0 : index
    %c0_61 = arith.constant 0 : index
    %123 = vector.load %arg13[%c0_60, %c0_61] : memref<32x32xf32, #tpu.memory_space<vmem>>, vector<32x32xf32>
    %cst_62 = arith.constant dense<0.000000e+00> : vector<8x32xf32>
    %124 = tpu.matmul %121, %123, %cst_62 {dimension_numbers = #tpu.dot_dimension_numbers<[1], [0], [0], [1], [0, 0, 1, 1], [], []>} : vector<8x32xf32>, vector<32x32xf32>, vector<8x32xf32> -> vector<8x32xf32>
    %c0_63 = arith.constant 0 : index
    %c0_64 = arith.constant 0 : index
    %125 = vector.load %arg14[%c0_63, %c0_64] : memref<1x32xf32, #tpu.memory_space<vmem>>, vector<1x32xf32>
    %126 = vector.broadcast %125 : vector<1x32xf32> to vector<8x32xf32>
    %127 = arith.addf %124, %126 : vector<8x32xf32>
    %c0_65 = arith.constant 0 : index
    %c0_66 = arith.constant 0 : index
    %128 = vector.load %arg15[%c0_65, %c0_66] : memref<32x32xf32, #tpu.memory_space<vmem>>, vector<32x32xf32>
    %cst_67 = arith.constant dense<0.000000e+00> : vector<16x32xf32>
    %129 = tpu.matmul %122, %128, %cst_67 {dimension_numbers = #tpu.dot_dimension_numbers<[1], [0], [0], [1], [0, 0, 1, 1], [], []>} : vector<16x32xf32>, vector<32x32xf32>, vector<16x32xf32> -> vector<16x32xf32>
    %c0_68 = arith.constant 0 : index
    %c0_69 = arith.constant 0 : index
    %130 = vector.load %arg16[%c0_68, %c0_69] : memref<1x32xf32, #tpu.memory_space<vmem>>, vector<1x32xf32>
    %131 = vector.broadcast %130 : vector<1x32xf32> to vector<16x32xf32>
    %132 = arith.addf %129, %131 : vector<16x32xf32>
    %c0_70 = arith.constant 0 : index
    %c0_71 = arith.constant 0 : index
    %133 = vector.load %arg17[%c0_70, %c0_71] : memref<32x32xf32, #tpu.memory_space<vmem>>, vector<32x32xf32>
    %cst_72 = arith.constant dense<0.000000e+00> : vector<16x32xf32>
    %134 = tpu.matmul %9, %133, %cst_72 {dimension_numbers = #tpu.dot_dimension_numbers<[1], [0], [0], [1], [0, 0, 1, 1], [], []>} : vector<16x32xf32>, vector<32x32xf32>, vector<16x32xf32> -> vector<16x32xf32>
    %c0_73 = arith.constant 0 : index
    %c0_74 = arith.constant 0 : index
    %135 = vector.load %arg18[%c0_73, %c0_74] : memref<1x32xf32, #tpu.memory_space<vmem>>, vector<1x32xf32>
    %136 = vector.broadcast %135 : vector<1x32xf32> to vector<16x32xf32>
    %137 = arith.addf %134, %136 : vector<16x32xf32>
    %c0_75 = arith.constant 0 : index
    %c0_76 = arith.constant 0 : index
    %138 = vector.load %arg19[%c0_75, %c0_76] : memref<32x32xf32, #tpu.memory_space<vmem>>, vector<32x32xf32>
    %cst_77 = arith.constant 0.000000e+00 : f32
    %139 = vector.broadcast %cst_77 : f32 to vector<8x32xf32>
    %cst_78 = arith.constant 0.000000e+00 : f32
    %140 = vector.broadcast %cst_78 : f32 to vector<8x16xf32>
    %141 = vector.extract_strided_slice %127 {offsets = [0, 0], sizes = [8, 8], strides = [1, 1]} : vector<8x32xf32> to vector<8x8xf32>
    %142 = vector.extract_strided_slice %132 {offsets = [0, 0], sizes = [16, 8], strides = [1, 1]} : vector<16x32xf32> to vector<16x8xf32>
    %cst_79 = arith.constant dense<0.000000e+00> : vector<8x16xf32>
    %143 = tpu.matmul %141, %142, %cst_79 {dimension_numbers = #tpu.dot_dimension_numbers<[1], [1], [0], [0], [0, 0, 1, 0], [], []>} : vector<8x8xf32>, vector<16x8xf32>, vector<8x16xf32> -> vector<8x16xf32>
    %144 = vector.broadcast %11 : vector<1x16xf32> to vector<8x16xf32>
    %145 = arith.addf %143, %144 : vector<8x16xf32>
    %cst_80 = arith.constant dense<0xFF800000> : vector<8xf32>
    %146 = vector.multi_reduction <maximumf>, %145, %cst_80 [1] : vector<8x16xf32> to vector<8xf32>
    %147 = vector.shape_cast %146 : vector<8xf32> to vector<8x1xf32>
    %148 = vector.broadcast %147 : vector<8x1xf32> to vector<8x16xf32>
    %149 = arith.subf %145, %148 : vector<8x16xf32>
    %150 = math.exp %149 : vector<8x16xf32>
    %cst_81 = arith.constant dense<0.000000e+00> : vector<8xf32>
    %151 = vector.multi_reduction <add>, %150, %cst_81 [1] : vector<8x16xf32> to vector<8xf32>
    %152 = vector.shape_cast %151 : vector<8xf32> to vector<8x1xf32>
    %153 = vector.broadcast %152 : vector<8x1xf32> to vector<8x16xf32>
    %154 = arith.divf %150, %153 : vector<8x16xf32>
    %155 = arith.addf %140, %154 : vector<8x16xf32>
    %156 = vector.extract_strided_slice %137 {offsets = [0, 0], sizes = [16, 8], strides = [1, 1]} : vector<16x32xf32> to vector<16x8xf32>
    %157 = vector.extract_strided_slice %138 {offsets = [0, 0], sizes = [8, 32], strides = [1, 1]} : vector<32x32xf32> to vector<8x32xf32>
    %cst_82 = arith.constant dense<0.000000e+00> : vector<16x32xf32>
    %158 = tpu.matmul %156, %157, %cst_82 {dimension_numbers = #tpu.dot_dimension_numbers<[1], [0], [0], [1], [0, 0, 1, 1], [], []>} : vector<16x8xf32>, vector<8x32xf32>, vector<16x32xf32> -> vector<16x32xf32>
    %cst_83 = arith.constant dense<0.000000e+00> : vector<8x32xf32>
    %159 = tpu.matmul %154, %158, %cst_83 {dimension_numbers = #tpu.dot_dimension_numbers<[1], [0], [0], [1], [0, 0, 1, 1], [], []>} : vector<8x16xf32>, vector<16x32xf32>, vector<8x32xf32> -> vector<8x32xf32>
    %160 = arith.addf %139, %159 : vector<8x32xf32>
    %161 = vector.extract_strided_slice %127 {offsets = [0, 8], sizes = [8, 8], strides = [1, 1]} : vector<8x32xf32> to vector<8x8xf32>
    %162 = vector.extract_strided_slice %132 {offsets = [0, 8], sizes = [16, 8], strides = [1, 1]} : vector<16x32xf32> to vector<16x8xf32>
    %cst_84 = arith.constant dense<0.000000e+00> : vector<8x16xf32>
    %163 = tpu.matmul %161, %162, %cst_84 {dimension_numbers = #tpu.dot_dimension_numbers<[1], [1], [0], [0], [0, 0, 1, 0], [], []>} : vector<8x8xf32>, vector<16x8xf32>, vector<8x16xf32> -> vector<8x16xf32>
    %164 = vector.broadcast %11 : vector<1x16xf32> to vector<8x16xf32>
    %165 = arith.addf %163, %164 : vector<8x16xf32>
    %cst_85 = arith.constant dense<0xFF800000> : vector<8xf32>
    %166 = vector.multi_reduction <maximumf>, %165, %cst_85 [1] : vector<8x16xf32> to vector<8xf32>
    %167 = vector.shape_cast %166 : vector<8xf32> to vector<8x1xf32>
    %168 = vector.broadcast %167 : vector<8x1xf32> to vector<8x16xf32>
    %169 = arith.subf %165, %168 : vector<8x16xf32>
    %170 = math.exp %169 : vector<8x16xf32>
    %cst_86 = arith.constant dense<0.000000e+00> : vector<8xf32>
    %171 = vector.multi_reduction <add>, %170, %cst_86 [1] : vector<8x16xf32> to vector<8xf32>
    %172 = vector.shape_cast %171 : vector<8xf32> to vector<8x1xf32>
    %173 = vector.broadcast %172 : vector<8x1xf32> to vector<8x16xf32>
    %174 = arith.divf %170, %173 : vector<8x16xf32>
    %175 = arith.addf %155, %174 : vector<8x16xf32>
    %176 = vector.extract_strided_slice %137 {offsets = [0, 8], sizes = [16, 8], strides = [1, 1]} : vector<16x32xf32> to vector<16x8xf32>
    %177 = vector.extract_strided_slice %138 {offsets = [8, 0], sizes = [8, 32], strides = [1, 1]} : vector<32x32xf32> to vector<8x32xf32>
    %cst_87 = arith.constant dense<0.000000e+00> : vector<16x32xf32>
    %178 = tpu.matmul %176, %177, %cst_87 {dimension_numbers = #tpu.dot_dimension_numbers<[1], [0], [0], [1], [0, 0, 1, 1], [], []>} : vector<16x8xf32>, vector<8x32xf32>, vector<16x32xf32> -> vector<16x32xf32>
    %cst_88 = arith.constant dense<0.000000e+00> : vector<8x32xf32>
    %179 = tpu.matmul %174, %178, %cst_88 {dimension_numbers = #tpu.dot_dimension_numbers<[1], [0], [0], [1], [0, 0, 1, 1], [], []>} : vector<8x16xf32>, vector<16x32xf32>, vector<8x32xf32> -> vector<8x32xf32>
    %180 = arith.addf %160, %179 : vector<8x32xf32>
    %181 = vector.extract_strided_slice %127 {offsets = [0, 16], sizes = [8, 8], strides = [1, 1]} : vector<8x32xf32> to vector<8x8xf32>
    %182 = vector.extract_strided_slice %132 {offsets = [0, 16], sizes = [16, 8], strides = [1, 1]} : vector<16x32xf32> to vector<16x8xf32>
    %cst_89 = arith.constant dense<0.000000e+00> : vector<8x16xf32>
    %183 = tpu.matmul %181, %182, %cst_89 {dimension_numbers = #tpu.dot_dimension_numbers<[1], [1], [0], [0], [0, 0, 1, 0], [], []>} : vector<8x8xf32>, vector<16x8xf32>, vector<8x16xf32> -> vector<8x16xf32>
    %184 = vector.broadcast %11 : vector<1x16xf32> to vector<8x16xf32>
    %185 = arith.addf %183, %184 : vector<8x16xf32>
    %cst_90 = arith.constant dense<0xFF800000> : vector<8xf32>
    %186 = vector.multi_reduction <maximumf>, %185, %cst_90 [1] : vector<8x16xf32> to vector<8xf32>
    %187 = vector.shape_cast %186 : vector<8xf32> to vector<8x1xf32>
    %188 = vector.broadcast %187 : vector<8x1xf32> to vector<8x16xf32>
    %189 = arith.subf %185, %188 : vector<8x16xf32>
    %190 = math.exp %189 : vector<8x16xf32>
    %cst_91 = arith.constant dense<0.000000e+00> : vector<8xf32>
    %191 = vector.multi_reduction <add>, %190, %cst_91 [1] : vector<8x16xf32> to vector<8xf32>
    %192 = vector.shape_cast %191 : vector<8xf32> to vector<8x1xf32>
    %193 = vector.broadcast %192 : vector<8x1xf32> to vector<8x16xf32>
    %194 = arith.divf %190, %193 : vector<8x16xf32>
    %195 = arith.addf %175, %194 : vector<8x16xf32>
    %196 = vector.extract_strided_slice %137 {offsets = [0, 16], sizes = [16, 8], strides = [1, 1]} : vector<16x32xf32> to vector<16x8xf32>
    %197 = vector.extract_strided_slice %138 {offsets = [16, 0], sizes = [8, 32], strides = [1, 1]} : vector<32x32xf32> to vector<8x32xf32>
    %cst_92 = arith.constant dense<0.000000e+00> : vector<16x32xf32>
    %198 = tpu.matmul %196, %197, %cst_92 {dimension_numbers = #tpu.dot_dimension_numbers<[1], [0], [0], [1], [0, 0, 1, 1], [], []>} : vector<16x8xf32>, vector<8x32xf32>, vector<16x32xf32> -> vector<16x32xf32>
    %cst_93 = arith.constant dense<0.000000e+00> : vector<8x32xf32>
    %199 = tpu.matmul %194, %198, %cst_93 {dimension_numbers = #tpu.dot_dimension_numbers<[1], [0], [0], [1], [0, 0, 1, 1], [], []>} : vector<8x16xf32>, vector<16x32xf32>, vector<8x32xf32> -> vector<8x32xf32>
    %200 = arith.addf %180, %199 : vector<8x32xf32>
    %201 = vector.extract_strided_slice %127 {offsets = [0, 24], sizes = [8, 8], strides = [1, 1]} : vector<8x32xf32> to vector<8x8xf32>
    %202 = vector.extract_strided_slice %132 {offsets = [0, 24], sizes = [16, 8], strides = [1, 1]} : vector<16x32xf32> to vector<16x8xf32>
    %cst_94 = arith.constant dense<0.000000e+00> : vector<8x16xf32>
    %203 = tpu.matmul %201, %202, %cst_94 {dimension_numbers = #tpu.dot_dimension_numbers<[1], [1], [0], [0], [0, 0, 1, 0], [], []>} : vector<8x8xf32>, vector<16x8xf32>, vector<8x16xf32> -> vector<8x16xf32>
    %204 = vector.broadcast %11 : vector<1x16xf32> to vector<8x16xf32>
    %205 = arith.addf %203, %204 : vector<8x16xf32>
    %cst_95 = arith.constant dense<0xFF800000> : vector<8xf32>
    %206 = vector.multi_reduction <maximumf>, %205, %cst_95 [1] : vector<8x16xf32> to vector<8xf32>
    %207 = vector.shape_cast %206 : vector<8xf32> to vector<8x1xf32>
    %208 = vector.broadcast %207 : vector<8x1xf32> to vector<8x16xf32>
    %209 = arith.subf %205, %208 : vector<8x16xf32>
    %210 = math.exp %209 : vector<8x16xf32>
    %cst_96 = arith.constant dense<0.000000e+00> : vector<8xf32>
    %211 = vector.multi_reduction <add>, %210, %cst_96 [1] : vector<8x16xf32> to vector<8xf32>
    %212 = vector.shape_cast %211 : vector<8xf32> to vector<8x1xf32>
    %213 = vector.broadcast %212 : vector<8x1xf32> to vector<8x16xf32>
    %214 = arith.divf %210, %213 : vector<8x16xf32>
    %215 = arith.addf %195, %214 : vector<8x16xf32>
    %216 = vector.extract_strided_slice %137 {offsets = [0, 24], sizes = [16, 8], strides = [1, 1]} : vector<16x32xf32> to vector<16x8xf32>
    %217 = vector.extract_strided_slice %138 {offsets = [24, 0], sizes = [8, 32], strides = [1, 1]} : vector<32x32xf32> to vector<8x32xf32>
    %cst_97 = arith.constant dense<0.000000e+00> : vector<16x32xf32>
    %218 = tpu.matmul %216, %217, %cst_97 {dimension_numbers = #tpu.dot_dimension_numbers<[1], [0], [0], [1], [0, 0, 1, 1], [], []>} : vector<16x8xf32>, vector<8x32xf32>, vector<16x32xf32> -> vector<16x32xf32>
    %cst_98 = arith.constant dense<0.000000e+00> : vector<8x32xf32>
    %219 = tpu.matmul %214, %218, %cst_98 {dimension_numbers = #tpu.dot_dimension_numbers<[1], [0], [0], [1], [0, 0, 1, 1], [], []>} : vector<8x16xf32>, vector<16x32xf32>, vector<8x32xf32> -> vector<8x32xf32>
    %220 = arith.addf %200, %219 : vector<8x32xf32>
    %cst_99 = arith.constant 2.500000e-01 : f32
    %221 = vector.broadcast %cst_99 : f32 to vector<8x16xf32>
    %222 = arith.mulf %215, %221 : vector<8x16xf32>
    %c0_100 = arith.constant 0 : index
    %c0_101 = arith.constant 0 : index
    %223 = vector.load %arg20[%c0_100, %c0_101] : memref<1x32xf32, #tpu.memory_space<vmem>>, vector<1x32xf32>
    %224 = vector.broadcast %223 : vector<1x32xf32> to vector<8x32xf32>
    %225 = arith.addf %220, %224 : vector<8x32xf32>
    %226 = arith.addf %121, %225 : vector<8x32xf32>
    %c0_102 = arith.constant 0 : index
    %c0_103 = arith.constant 0 : index
    %227 = vector.load %arg27[%c0_102, %c0_103] : memref<1x32xf32, #tpu.memory_space<vmem>>, vector<1x32xf32>
    %c0_104 = arith.constant 0 : index
    %c0_105 = arith.constant 0 : index
    %228 = vector.load %arg28[%c0_104, %c0_105] : memref<1x32xf32, #tpu.memory_space<vmem>>, vector<1x32xf32>
    %cst_106 = arith.constant dense<0.000000e+00> : vector<8xf32>
    %229 = vector.multi_reduction <add>, %226, %cst_106 [1] : vector<8x32xf32> to vector<8xf32>
    %230 = vector.shape_cast %229 : vector<8xf32> to vector<8x1xf32>
    %cst_107 = arith.constant 3.200000e+01 : f32
    %231 = vector.broadcast %cst_107 : f32 to vector<8x1xf32>
    %232 = arith.divf %230, %231 : vector<8x1xf32>
    %233 = vector.broadcast %232 : vector<8x1xf32> to vector<8x32xf32>
    %234 = arith.subf %226, %233 : vector<8x32xf32>
    %235 = arith.mulf %234, %234 : vector<8x32xf32>
    %cst_108 = arith.constant dense<0.000000e+00> : vector<8xf32>
    %236 = vector.multi_reduction <add>, %235, %cst_108 [1] : vector<8x32xf32> to vector<8xf32>
    %237 = vector.shape_cast %236 : vector<8xf32> to vector<8x1xf32>
    %cst_109 = arith.constant 3.200000e+01 : f32
    %238 = vector.broadcast %cst_109 : f32 to vector<8x1xf32>
    %239 = arith.divf %237, %238 : vector<8x1xf32>
    %cst_110 = arith.constant 9.99999974E-6 : f32
    %240 = vector.broadcast %cst_110 : f32 to vector<8x1xf32>
    %241 = arith.addf %239, %240 : vector<8x1xf32>
    %242 = math.rsqrt %241 : vector<8x1xf32>
    %243 = vector.broadcast %242 : vector<8x1xf32> to vector<8x32xf32>
    %244 = arith.mulf %234, %243 : vector<8x32xf32>
    %245 = vector.broadcast %227 : vector<1x32xf32> to vector<8x32xf32>
    %246 = arith.mulf %244, %245 : vector<8x32xf32>
    %247 = vector.broadcast %228 : vector<1x32xf32> to vector<8x32xf32>
    %248 = arith.addf %246, %247 : vector<8x32xf32>
    %c0_111 = arith.constant 0 : index
    %c0_112 = arith.constant 0 : index
    %249 = vector.load %arg21[%c0_111, %c0_112] : memref<32x64xf32, #tpu.memory_space<vmem>>, vector<32x64xf32>
    %cst_113 = arith.constant dense<0.000000e+00> : vector<8x64xf32>
    %250 = tpu.matmul %248, %249, %cst_113 {dimension_numbers = #tpu.dot_dimension_numbers<[1], [0], [0], [1], [0, 0, 1, 1], [], []>} : vector<8x32xf32>, vector<32x64xf32>, vector<8x64xf32> -> vector<8x64xf32>
    %c0_114 = arith.constant 0 : index
    %c0_115 = arith.constant 0 : index
    %251 = vector.load %arg22[%c0_114, %c0_115] : memref<1x64xf32, #tpu.memory_space<vmem>>, vector<1x64xf32>
    %252 = vector.broadcast %251 : vector<1x64xf32> to vector<8x64xf32>
    %253 = arith.addf %250, %252 : vector<8x64xf32>
    %cst_116 = arith.constant 0.000000e+00 : f32
    %254 = vector.broadcast %cst_116 : f32 to vector<8x64xf32>
    %255 = arith.maximumf %253, %254 : vector<8x64xf32>
    %c0_117 = arith.constant 0 : index
    %c0_118 = arith.constant 0 : index
    %256 = vector.load %arg23[%c0_117, %c0_118] : memref<64x32xf32, #tpu.memory_space<vmem>>, vector<64x32xf32>
    %cst_119 = arith.constant dense<0.000000e+00> : vector<8x32xf32>
    %257 = tpu.matmul %255, %256, %cst_119 {dimension_numbers = #tpu.dot_dimension_numbers<[1], [0], [0], [1], [0, 0, 1, 1], [], []>} : vector<8x64xf32>, vector<64x32xf32>, vector<8x32xf32> -> vector<8x32xf32>
    %c0_120 = arith.constant 0 : index
    %c0_121 = arith.constant 0 : index
    %258 = vector.load %arg24[%c0_120, %c0_121] : memref<1x32xf32, #tpu.memory_space<vmem>>, vector<1x32xf32>
    %259 = vector.broadcast %258 : vector<1x32xf32> to vector<8x32xf32>
    %260 = arith.addf %257, %259 : vector<8x32xf32>
    %261 = arith.addf %248, %260 : vector<8x32xf32>
    %c0_122 = arith.constant 0 : index
    %c0_123 = arith.constant 0 : index
    %262 = vector.load %arg29[%c0_122, %c0_123] : memref<1x32xf32, #tpu.memory_space<vmem>>, vector<1x32xf32>
    %c0_124 = arith.constant 0 : index
    %c0_125 = arith.constant 0 : index
    %263 = vector.load %arg30[%c0_124, %c0_125] : memref<1x32xf32, #tpu.memory_space<vmem>>, vector<1x32xf32>
    %cst_126 = arith.constant dense<0.000000e+00> : vector<8xf32>
    %264 = vector.multi_reduction <add>, %261, %cst_126 [1] : vector<8x32xf32> to vector<8xf32>
    %265 = vector.shape_cast %264 : vector<8xf32> to vector<8x1xf32>
    %cst_127 = arith.constant 3.200000e+01 : f32
    %266 = vector.broadcast %cst_127 : f32 to vector<8x1xf32>
    %267 = arith.divf %265, %266 : vector<8x1xf32>
    %268 = vector.broadcast %267 : vector<8x1xf32> to vector<8x32xf32>
    %269 = arith.subf %261, %268 : vector<8x32xf32>
    %270 = arith.mulf %269, %269 : vector<8x32xf32>
    %cst_128 = arith.constant dense<0.000000e+00> : vector<8xf32>
    %271 = vector.multi_reduction <add>, %270, %cst_128 [1] : vector<8x32xf32> to vector<8xf32>
    %272 = vector.shape_cast %271 : vector<8xf32> to vector<8x1xf32>
    %cst_129 = arith.constant 3.200000e+01 : f32
    %273 = vector.broadcast %cst_129 : f32 to vector<8x1xf32>
    %274 = arith.divf %272, %273 : vector<8x1xf32>
    %cst_130 = arith.constant 9.99999974E-6 : f32
    %275 = vector.broadcast %cst_130 : f32 to vector<8x1xf32>
    %276 = arith.addf %274, %275 : vector<8x1xf32>
    %277 = math.rsqrt %276 : vector<8x1xf32>
    %278 = vector.broadcast %277 : vector<8x1xf32> to vector<8x32xf32>
    %279 = arith.mulf %269, %278 : vector<8x32xf32>
    %280 = vector.broadcast %262 : vector<1x32xf32> to vector<8x32xf32>
    %281 = arith.mulf %279, %280 : vector<8x32xf32>
    %282 = vector.broadcast %263 : vector<1x32xf32> to vector<8x32xf32>
    %283 = arith.addf %281, %282 : vector<8x32xf32>
    %c0_131 = arith.constant 0 : index
    %c0_132 = arith.constant 0 : index
    %c0_133 = arith.constant 0 : index
    %284 = vector.load %arg31[%c0_131, %c0_132, %c0_133] : memref<1x8x32xf32, #tpu.memory_space<vmem>>, vector<1x8x32xf32>
    %285 = vector.shape_cast %284 : vector<1x8x32xf32> to vector<8x32xf32>
    %286 = vector.shape_cast %283 : vector<8x32xf32> to vector<1x8x32xf32>
    tpu.vector_store %arg31[%c0_131, %c0_132, %c0_133], %286 {strides = array<i32>} : memref<1x8x32xf32, #tpu.memory_space<vmem>>, vector<1x8x32xf32>,
    %c0_134 = arith.constant 0 : index
    %c0_135 = arith.constant 0 : index
    %c0_136 = arith.constant 0 : index
    %287 = vector.load %arg32[%c0_134, %c0_135, %c0_136] : memref<1x8x16xf32, #tpu.memory_space<vmem>>, vector<1x8x16xf32>
    %288 = vector.shape_cast %287 : vector<1x8x16xf32> to vector<8x16xf32>
    %289 = vector.shape_cast %222 : vector<8x16xf32> to vector<1x8x16xf32>
    tpu.vector_store %arg32[%c0_134, %c0_135, %c0_136], %289 {strides = array<i32>} : memref<1x8x16xf32, #tpu.memory_space<vmem>>, vector<1x8x16xf32>,
    return
  }
  func.func @transform_0(%arg0: i32) -> (i32, i32, i32) {
    %c0_i32 = arith.constant 0 : i32
    %c0_i32_0 = arith.constant 0 : i32
    %c0_i32_1 = arith.constant 0 : i32
    return %arg0, %c0_i32, %c0_i32_0 : i32, i32, i32
  }
  func.func @transform_1(%arg0: i32) -> (i32, i32, i32) {
    %c0_i32 = arith.constant 0 : i32
    %c0_i32_0 = arith.constant 0 : i32
    %c0_i32_1 = arith.constant 0 : i32
    return %arg0, %c0_i32, %c0_i32_0 : i32, i32, i32
  }
  func.func @transform_2(%arg0: i32) -> (i32, i32, i32) {
    %c0_i32 = arith.constant 0 : i32
    %c0_i32_0 = arith.constant 0 : i32
    %c0_i32_1 = arith.constant 0 : i32
    return %arg0, %c0_i32, %c0_i32_0 : i32, i32, i32
  }
  func.func @transform_3(%arg0: i32) -> (i32, i32, i32) {
    %c0_i32 = arith.constant 0 : i32
    %c0_i32_0 = arith.constant 0 : i32
    %c0_i32_1 = arith.constant 0 : i32
    return %arg0, %c0_i32, %c0_i32_0 : i32, i32, i32
  }
  func.func @transform_4(%arg0: i32) -> (i32, i32, i32) {
    %c0_i32 = arith.constant 0 : i32
    %c0_i32_0 = arith.constant 0 : i32
    %c0_i32_1 = arith.constant 0 : i32
    return %arg0, %c0_i32, %c0_i32_0 : i32, i32, i32
  }
  func.func @transform_5(%arg0: i32) -> (i32, i32, i32) {
    %c0_i32 = arith.constant 0 : i32
    %c0_i32_0 = arith.constant 0 : i32
    %c0_i32_1 = arith.constant 0 : i32
    return %arg0, %c0_i32, %c0_i32_0 : i32, i32, i32
  }
  func.func @transform_6(%arg0: i32) -> (i32, i32) {
    %c0_i32 = arith.constant 0 : i32
    %c0_i32_0 = arith.constant 0 : i32
    %c0_i32_1 = arith.constant 0 : i32
    return %c0_i32, %c0_i32_0 : i32, i32
  }
  func.func @transform_7(%arg0: i32) -> (i32, i32) {
    %c0_i32 = arith.constant 0 : i32
    %c0_i32_0 = arith.constant 0 : i32
    %c0_i32_1 = arith.constant 0 : i32
    return %c0_i32, %c0_i32_0 : i32, i32
  }
  func.func @transform_8(%arg0: i32) -> (i32, i32) {
    %c0_i32 = arith.constant 0 : i32
    %c0_i32_0 = arith.constant 0 : i32
    %c0_i32_1 = arith.constant 0 : i32
    return %c0_i32, %c0_i32_0 : i32, i32
  }
  func.func @transform_9(%arg0: i32) -> (i32, i32) {
    %c0_i32 = arith.constant 0 : i32
    %c0_i32_0 = arith.constant 0 : i32
    %c0_i32_1 = arith.constant 0 : i32
    return %c0_i32, %c0_i32_0 : i32, i32
  }
  func.func @transform_10(%arg0: i32) -> (i32, i32) {
    %c0_i32 = arith.constant 0 : i32
    %c0_i32_0 = arith.constant 0 : i32
    %c0_i32_1 = arith.constant 0 : i32
    return %c0_i32, %c0_i32_0 : i32, i32
  }
  func.func @transform_11(%arg0: i32) -> (i32, i32) {
    %c0_i32 = arith.constant 0 : i32
    %c0_i32_0 = arith.constant 0 : i32
    %c0_i32_1 = arith.constant 0 : i32
    return %c0_i32, %c0_i32_0 : i32, i32
  }
  func.func @transform_12(%arg0: i32) -> (i32, i32) {
    %c0_i32 = arith.constant 0 : i32
    %c0_i32_0 = arith.constant 0 : i32
    %c0_i32_1 = arith.constant 0 : i32
    return %c0_i32, %c0_i32_0 : i32, i32
  }
  func.func @transform_13(%arg0: i32) -> (i32, i32) {
    %c0_i32 = arith.constant 0 : i32
    %c0_i32_0 = arith.constant 0 : i32
    %c0_i32_1 = arith.constant 0 : i32
    return %c0_i32, %c0_i32_0 : i32, i32
  }
  func.func @transform_14(%arg0: i32) -> (i32, i32) {
    %c0_i32 = arith.constant 0 : i32
    %c0_i32_0 = arith.constant 0 : i32
    %c0_i32_1 = arith.constant 0 : i32
    return %c0_i32, %c0_i32_0 : i32, i32
  }
  func.func @transform_15(%arg0: i32) -> (i32, i32) {
    %c0_i32 = arith.constant 0 : i32
    %c0_i32_0 = arith.constant 0 : i32
    %c0_i32_1 = arith.constant 0 : i32
    return %c0_i32, %c0_i32_0 : i32, i32
  }
  func.func @transform_16(%arg0: i32) -> (i32, i32) {
    %c0_i32 = arith.constant 0 : i32
    %c0_i32_0 = arith.constant 0 : i32
    %c0_i32_1 = arith.constant 0 : i32
    return %c0_i32, %c0_i32_0 : i32, i32
  }
  func.func @transform_17(%arg0: i32) -> (i32, i32) {
    %c0_i32 = arith.constant 0 : i32
    %c0_i32_0 = arith.constant 0 : i32
    %c0_i32_1 = arith.constant 0 : i32
    return %c0_i32, %c0_i32_0 : i32, i32
  }
  func.func @transform_18(%arg0: i32) -> (i32, i32) {
    %c0_i32 = arith.constant 0 : i32
    %c0_i32_0 = arith.constant 0 : i32
    %c0_i32_1 = arith.constant 0 : i32
    return %c0_i32, %c0_i32_0 : i32, i32
  }
  func.func @transform_19(%arg0: i32) -> (i32, i32) {
    %c0_i32 = arith.constant 0 : i32
    %c0_i32_0 = arith.constant 0 : i32
    %c0_i32_1 = arith.constant 0 : i32
    return %c0_i32, %c0_i32_0 : i32, i32
  }
  func.func @transform_20(%arg0: i32) -> (i32, i32) {
    %c0_i32 = arith.constant 0 : i32
    %c0_i32_0 = arith.constant 0 : i32
    %c0_i32_1 = arith.constant 0 : i32
    return %c0_i32, %c0_i32_0 : i32, i32
  }
  func.func @transform_21(%arg0: i32) -> (i32, i32) {
    %c0_i32 = arith.constant 0 : i32
    %c0_i32_0 = arith.constant 0 : i32
    %c0_i32_1 = arith.constant 0 : i32
    return %c0_i32, %c0_i32_0 : i32, i32
  }
  func.func @transform_22(%arg0: i32) -> (i32, i32) {
    %c0_i32 = arith.constant 0 : i32
    %c0_i32_0 = arith.constant 0 : i32
    %c0_i32_1 = arith.constant 0 : i32
    return %c0_i32, %c0_i32_0 : i32, i32
  }
  func.func @transform_23(%arg0: i32) -> (i32, i32) {
    %c0_i32 = arith.constant 0 : i32
    %c0_i32_0 = arith.constant 0 : i32
    %c0_i32_1 = arith.constant 0 : i32
    return %c0_i32, %c0_i32_0 : i32, i32
  }
  func.func @transform_24(%arg0: i32) -> (i32, i32) {
    %c0_i32 = arith.constant 0 : i32
    %c0_i32_0 = arith.constant 0 : i32
    %c0_i32_1 = arith.constant 0 : i32
    return %c0_i32, %c0_i32_0 : i32, i32
  }
  func.func @transform_25(%arg0: i32) -> (i32, i32) {
    %c0_i32 = arith.constant 0 : i32
    %c0_i32_0 = arith.constant 0 : i32
    %c0_i32_1 = arith.constant 0 : i32
    return %c0_i32, %c0_i32_0 : i32, i32
  }
  func.func @transform_26(%arg0: i32) -> (i32, i32) {
    %c0_i32 = arith.constant 0 : i32
    %c0_i32_0 = arith.constant 0 : i32
    %c0_i32_1 = arith.constant 0 : i32
    return %c0_i32, %c0_i32_0 : i32, i32
  }
  func.func @transform_27(%arg0: i32) -> (i32, i32) {
    %c0_i32 = arith.constant 0 : i32
    %c0_i32_0 = arith.constant 0 : i32
    %c0_i32_1 = arith.constant 0 : i32
    return %c0_i32, %c0_i32_0 : i32, i32
  }
  func.func @transform_28(%arg0: i32) -> (i32, i32) {
    %c0_i32 = arith.constant 0 : i32
    %c0_i32_0 = arith.constant 0 : i32
    %c0_i32_1 = arith.constant 0 : i32
    return %c0_i32, %c0_i32_0 : i32, i32
  }
  func.func @transform_29(%arg0: i32) -> (i32, i32) {
    %c0_i32 = arith.constant 0 : i32
    %c0_i32_0 = arith.constant 0 : i32
    %c0_i32_1 = arith.constant 0 : i32
    return %c0_i32, %c0_i32_0 : i32, i32
  }
  func.func @transform_30(%arg0: i32) -> (i32, i32, i32) {
    %c0_i32 = arith.constant 0 : i32
    %c0_i32_0 = arith.constant 0 : i32
    %c0_i32_1 = arith.constant 0 : i32
    return %arg0, %c0_i32, %c0_i32_0 : i32, i32, i32
  }
  func.func @transform_31(%arg0: i32) -> (i32, i32, i32) {
    %c0_i32 = arith.constant 0 : i32
    %c0_i32_0 = arith.constant 0 : i32
    %c0_i32_1 = arith.constant 0 : i32
    return %arg0, %c0_i32, %c0_i32_0 : i32, i32, i32
  }
}

</mosaic_0001>

<bundles_post_ra>
// kernel: tpu_custom_call.1
= control target key start
LH: loop header
LB: loop body
LE: loop exit
PB: predicated region body
PF: predicated region fallthrough
CT: control target
= control target key end

     0   :  { %s5741_s6 = smov 1   ;;  %s5742_s10 = smov 2   ;;  %s6703_s0 = inlined_call_operand.smem [shape: u32[32], index: -1, kind: input, shape index: {}] }
   0x1   :  { %s5810_s5 = sld [smem:[%s6703_s0]]   ;;  %s5743_s14 = smov 3  }
   0x2   :  { %s5815_s9 = sld [smem:[%s6703_s0 + %s5741_s6]]   ;;  %s5744_s18 = smov 4  }
   0x3   :  { %s5820_s13 = sld [smem:[%s6703_s0 + %s5742_s10]]   ;;  %s5745_s22 = smov 5  }
   0x4   :  { %s5825_s17 = sld [smem:[%s6703_s0 + %s5743_s14]]   ;;  %s5746_s26 = smov 6  }
   0x5   :  { %s5830_s21 = sld [smem:[%s6703_s0 + %s5744_s18]]   ;;  %s5747_s30 = smov 7  }
   0x6   :  { %s5835_s25 = sld [smem:[%s6703_s0 + %s5745_s22]]   ;;  %s5748_s4 = smov 8  }
   0x7   :  { %6739 = sst [smem:[#allocation42_spill]] %s5810_s5  ;;  %s5749_s10 = smov 9  }
   0x8   :  { %s5840_s29 = sld [smem:[%s6703_s0 + %s5746_s26]]   ;;  %s5750_s15 = smov 10  }
   0x9   :  { %6740 = sst [smem:[#allocation43_spill]] %s5820_s13  ;;  %s5751_s20 = smov 11  }
   0xa   :  { %6741 = sst [smem:[#allocation44_spill]] %s5825_s17  ;;  %s5752_s26 = smov 12  }
   0xb   :  { %6742 = sst [smem:[#allocation45_spill]] %s5830_s21  ;;  %s5753_s1 = smov 13  }
   0xc   :  { %6743 = sst [smem:[#allocation46_spill]] %s5835_s25  ;;  %s5754_s7 = smov 14  }
   0xd   :  { %s5845_s3 = sld [smem:[%s6703_s0 + %s5747_s30]]   ;;  %s5756_s22 = smov 16  }
   0xe   :  { %6744 = sst [smem:[#allocation47_spill]] %s5840_s29  ;;  %s5757_s28 = smov 17  }
   0xf   :  { %s5850_s8 = sld [smem:[%s6703_s0 + %s5748_s4]]  }
  0x10   :  { %s5855_s14 = sld [smem:[%s6703_s0 + %s5749_s10]]  }
  0x11   :  { %s5860_s19 = sld [smem:[%s6703_s0 + %s5750_s15]]   ;;  %s5755_s15 = smov 15  }
  0x12   :  { %s5865_s24 = sld [smem:[%s6703_s0 + %s5751_s20]]  }
  0x13   :  { %6745 = sst [smem:[#allocation48_spill]] %s5845_s3 }
  0x14   :  { %s5870_s30 = sld [smem:[%s6703_s0 + %s5752_s26]]  }
  0x15   :  { %6746 = sst [smem:[#allocation49_spill]] %s5850_s8 }
  0x16   :  { %s5875_s6 = sld [smem:[%s6703_s0 + %s5753_s1]]  }
  0x17   :  { %6747 = sst [smem:[#allocation50_spill]] %s5860_s19 }
  0x18   :  { %6748 = sst [smem:[#allocation51_spill]] %s5865_s24 }
  0x19   :  { %s5880_s12 = sld [smem:[%s6703_s0 + %s5754_s7]]   ;;  %s5758_s7 = smov 18  }
  0x1a   :  { %s5885_s20 = sld [smem:[%s6703_s0 + %s5755_s15]]   ;;  %s5759_s15 = smov 19  }
  0x1b   :  { %s5890_s27 = sld [smem:[%s6703_s0 + %s5756_s22]]   ;;  %s5760_s22 = smov 20  }
  0x1c   :  { %6749 = sst [smem:[#allocation52_spill]] %s5875_s6 }
  0x1d   :  { %s5895_s4 = sld [smem:[%s6703_s0 + %s5757_s28]]   ;;  %s5761_s28 = smov 21  }
  0x1e   :  { %s5900_s21 = sld [smem:[%s6703_s0 + %s5758_s7]]   ;;  %s5762_s7 = smov 22  }
  0x1f   :  { %s5905_s17 = sld [smem:[%s6703_s0 + %s5759_s15]]   ;;  %s5763_s15 = smov 23  }
  0x20   :  { %6750 = sst [smem:[#allocation53_spill]] %s5885_s20 }
  0x21   :  { %s5910_s13 = sld [smem:[%s6703_s0 + %s5760_s22]]   ;;  %s5764_s22 = smov 24  }
  0x22   :  { %s5915_s19 = sld [smem:[%s6703_s0 + %s5761_s28]]   ;;  %s5765_s28 = smov 25  }
  0x23   :  { %6751 = sst [smem:[#allocation54_spill]] %s5895_s4 }
  0x24   :  { %s5920_s25 = sld [smem:[%s6703_s0 + %s5762_s7]]   ;;  %s5766_s7 = smov 26  }
  0x25   :  { %6752 = sst [smem:[#allocation55_spill]] %s5905_s17 }
  0x26   :  { %s5925_s17 = sld [smem:[%s6703_s0 + %s5763_s15]]   ;;  %s5767_s15 = smov 27  }
  0x27   :  { %s5930_s5 = sld [smem:[%s6703_s0 + %s5764_s22]]   ;;  %s5768_s22 = smov 28  }
  0x28   :  { %6753 = sst [smem:[#allocation56_spill]] %s5915_s19 }
  0x29   :  { %s5935_s19 = sld [smem:[%s6703_s0 + %s5765_s28]]   ;;  %s5769_s28 = smov 29  }
  0x2a   :  { %6754 = sst [smem:[#allocation57_spill]] %s5920_s25 }
  0x2b   :  { %s5940_s25 = sld [smem:[%s6703_s0 + %s5766_s7]]   ;;  %s5770_s7 = smov 30  }
  0x2c   :  { %6755 = sst [smem:[#allocation58_spill]] %s5925_s17 }
  0x2d   :  { %6756 = sst [smem:[#allocation59_spill]] %s5930_s5 }
  0x2e   :  { %s5945_s17 = sld [smem:[%s6703_s0 + %s5767_s15]]   ;;  %s5771_s15 = smov 31  }
  0x2f   :  { %6757 = sst [smem:[#allocation60_spill]] %s5935_s19 }
  0x30   :  { %s5950_s5 = sld [smem:[%s6703_s0 + %s5768_s22]]  }
  0x31   :  { %6758 = sst [smem:[#allocation61_spill]] %s5940_s25 }
  0x32   :  { %s5955_s19 = sld [smem:[%s6703_s0 + %s5769_s28]]  }
  0x33   :  { %s5960_s25 = sld [smem:[%s6703_s0 + %s5770_s7]]  }
  0x34   :  { %6759 = sst [smem:[#allocation62_spill]] %s5945_s17 }
  0x35   :  { %s5965_s17 = sld [smem:[%s6703_s0 + %s5771_s15]]  }
  0x38   :  { %6760 = sst [smem:[#allocation63_spill]] %s5955_s19 }
  0x39   :  { %6761 = sst [smem:[#allocation64_spill]] %s5960_s25 }
  0x3a   :  { %69 = vsyncpa [#allocation3], 0 }
  0x3b   :  { %71 = vsyncpa [#allocation3 + $0x1], 0 }
  0x3c   :  { %72 = vsyncpa [#allocation6], 0 }
  0x3d   :  { %74 = vsyncpa [#allocation6 + $0x1], 0 }
  0x3e   :  { %75 = vsyncpa [#allocation9], 0 }
  0x3f   :  { %76 = vsyncpa [#allocation12], 0 }
  0x40   :  { %77 = vsyncpa [#allocation15], 0 }
  0x41   :  { %78 = vsyncpa [#allocation18], 0 }
  0x42   :  { %79 = vsyncpa [#allocation21], 0 }
  0x43   :  { %80 = vsyncpa [#allocation24], 0 }
  0x44   :  { %81 = vsyncpa [#allocation27], 0 }
  0x45   :  { %82 = vsyncpa [#allocation4], 0 }
  0x46   :  { %84 = vsyncpa [#allocation4 + $0x1], 0 }
  0x47   :  { %85 = vsyncpa [#allocation30], 0 }
  0x48   :  { %87 = vsyncpa [#allocation30 + $0x1], 0  ;;  %s5967_s22 = smov 0   ;;  %s5969_s23 = smov 0  }
  0x49   :  { %s5971_s0 = smov 0   ;;  %s5973_s26 = smov 0  }
  0x4a LB: > { %s6762_s3 = sld [smem:[#allocation48_spill]]  ;;  %s6763_s29 = sld [smem:[#allocation47_spill]]  ;;  %s5735_s0 = sphi %s5971_s0, %s6833_s0   ;;  %s5731_s23 = sphi %s5969_s23, %s6835_s23   ;;  %s5727_s22 = sphi %s5967_s22, %s6834_s22   ;;  %s5739_s26 = sphi %s5973_s26, %s6831_s26  }
  0x4b   : > { %s6764_s24 = sld [smem:[#allocation51_spill]]  ;;  %s6765_s20 = sld [smem:[#allocation53_spill]] }
  0x4c   : > { %s6766_s6 = sld [smem:[#allocation52_spill]]  ;;  %s6767_s4 = sld [smem:[#allocation54_spill]] }
  0x4d   : > { %s6768_s8 = sld [smem:[#allocation49_spill]]  ;;  %6769 = sst [smem:[#allocation65_spill]] %s5727_s22 }
  0x4e   : > { %6770 = sst [smem:[#allocation66_spill]] %s5735_s0  ;;  %s5772_s28 = smov [#allocation8]  }
  0x4f   : > { %s822_s1 = sshll.u32 %s5772_s28, 4  ;;  %s5988_s2 = sadd.s32 4294967295, %s5739_s26   ;;  %s5993_s1 = int_to_ptr.vmem [resolvable:$true] %s822_s1 }
  0x50   : > { %p4347_p0 = scmp.ge.s32.totalorder %s5739_s26, 1  ;;  %p6709_p1 = scmp.eq.s32.totalorder %s5988_s2, 0 }
  0x51   : > { %p810_p2 = scmp.lt.s32.totalorder %s5739_s26, 3  ;;  %s5773_s10 = smov [#allocation11]  }
  0x52   : > { %s846_s11 = sshll.u32 %s5773_s10, 4  ;;  %s5774_s16 = smov [#allocation14]   ;;  %s6008_s11 = int_to_ptr.vmem [resolvable:$true] %s846_s11 }
  0x53   : > { %p5995_p3 = pnand %p4347_p0, %p810_p2  ;;  %s874_s18 = sshll.u32 %s5774_s16, 4  ;;  %s6010_s18 = int_to_ptr.vmem [resolvable:$true] %s874_s18 }
  0x54   : > { %s5155_s28 = scalar_lea.hbm %s6763_s29, 512 }
  0x55   : > { %s6771_s7 = scalar_select %p5995_p3, 1, 0 }
  0x56   : > { %p4929_p5 = pneg %p5995_p3  ;;  %p5156_p7 = scmp.ne.s32.totalorder %s6763_s29, %s5155_s28 }
  0x57   : > { %p5162_p11 = scmp.lt.u32.totalorder %s5155_s28, %s6763_s29 }
  0x58   : > { %p6004_p6 = pnand %p4929_p5, %p6709_p1 }
  0x5a   : > { %s6772_s15 = scalar_select %p6004_p6, 1, 0 }
  0x5b   : > { %p6016_p8 = pneg %p6004_p6 }
  0x5d   : > { %s6773_s25 = scalar_select %p6016_p8, 1, 0 }
  0x5e   : > { %p5158_p9 = pnand %p6016_p8, %p5156_p7 }
  0x60   : > { %p5159_p10 = pneg %p5158_p9 }
  0x62   : > { %p5164_p12 = pnand %p5162_p11, %p5159_p10 }
  0x64   : > { %5167 = shalt.err (!%p5164_p12)
}
  0x65   : > { %s5168_s10 = scalar_lea.vmem %s5993_s1, 512  ;;  %p5176_p5 = scmp.lt.s32.totalorder %s5993_s1, %s5993_s1 }
  0x66   : > { %p5169_p13 = scmp.ne.s32.totalorder %s5993_s1, %s5168_s10  ;;  %p5177_p4 = scmp.lt.s32.totalorder %s5168_s10, %s5168_s10 }
  0x68   : > { %p5171_p0 = pnand %p5169_p13, %p6016_p8  ;;  %p5178_p1 = por %p5177_p4, %p5176_p5 }
  0x6a   : > { %p5172_p2 = pneg %p5171_p0 }
  0x6c   : > { %p5179_p3 = pnand %p5178_p1, %p5172_p2 }
  0x6e   : > { %5182 = shalt.err (!%p5179_p3)
}
  0x6f   : > { %s6711_s16 = smov 128   ;;  %s6713_s28 = smov 8  }
  0x70   : > { %4932 = dma.hbm_to_vmem [thread:$0]  (!%p6004_p6), %s6763_s29, 512, %s5993_s1, [#allocation9], %s6711_s16, %s6711_s16, %s6713_s28  }
  0x71   : > { %s5183_s19 = scalar_lea.hbm %s6768_s8, 512 }
  0x72   : > { %p5184_p7 = scmp.ne.s32.totalorder %s6768_s8, %s5183_s19  ;;  %p5190_p3 = scmp.lt.u32.totalorder %s5183_s19, %s6768_s8 }
  0x74   : > { %p5186_p4 = pnand %p5184_p7, %p6016_p8 }
  0x76   : > { %p5187_p1 = pneg %p5186_p4 }
  0x78   : > { %p5192_p9 = pnand %p5190_p3, %p5187_p1 }
  0x7a   : > { %5195 = shalt.err (!%p5192_p9)
}
  0x7b   : > { %s5196_s10 = scalar_lea.vmem %s6008_s11, 512  ;;  %p5204_p13 = scmp.lt.s32.totalorder %s6008_s11, %s6008_s11 }
  0x7c   : > { %p5197_p10 = scmp.ne.s32.totalorder %s6008_s11, %s5196_s10  ;;  %p5205_p0 = scmp.lt.s32.totalorder %s5196_s10, %s5196_s10 }
  0x7e   : > { %p5199_p11 = pnand %p5197_p10, %p6016_p8  ;;  %p5206_p2 = por %p5205_p0, %p5204_p13 }
  0x80   : > { %p5200_p12 = pneg %p5199_p11 }
  0x82   : > { %p5207_p5 = pnand %p5206_p2, %p5200_p12 }
  0x84   : > { %5210 = shalt.err (!%p5207_p5)
}
  0x85   : > { %4938 = dma.hbm_to_vmem [thread:$0]  (!%p6004_p6), %s6768_s8, 512, %s6008_s11, [#allocation12], %s6711_s16, %s6711_s16, %s6713_s28  }
  0x86   : > { %s5211_s19 = scalar_lea.hbm %s6764_s24, 16 }
  0x87   : > { %p5212_p7 = scmp.ne.s32.totalorder %s6764_s24, %s5211_s19  ;;  %p5218_p3 = scmp.lt.u32.totalorder %s5211_s19, %s6764_s24 }
  0x89   : > { %p5214_p4 = pnand %p5212_p7, %p6016_p8 }
  0x8b   : > { %p5215_p1 = pneg %p5214_p4 }
  0x8d   : > { %p5220_p9 = pnand %p5218_p3, %p5215_p1 }
  0x8f   : > { %5223 = shalt.err (!%p5220_p9)
}
  0x90   : > { %s5224_s1 = scalar_lea.vmem %s6010_s18, 16  ;;  %s5231_s10 = scalar_lea.vmem %s6010_s18, 32 }
  0x91   : > { %p5225_p10 = scmp.ne.s32.totalorder %s6010_s18, %s5224_s1  ;;  %p5232_p13 = scmp.lt.s32.totalorder %s6010_s18, %s6010_s18 }
  0x92   : > { %p5233_p0 = scmp.lt.s32.totalorder %s5231_s10, %s5224_s1 }
  0x93   : > { %p5227_p11 = pnand %p5225_p10, %p6016_p8 }
  0x94   : > { %p5234_p2 = por %p5233_p0, %p5232_p13 }
  0x95   : > { %p5228_p12 = pneg %p5227_p11 }
  0x97   : > { %p5235_p5 = pnand %p5234_p2, %p5228_p12 }
  0x99   : > { %5238 = shalt.err (!%p5235_p5)
}
  0x9a   : > { %4944 = dma.hbm_to_vmem [thread:$0]  (!%p6004_p6), %s6764_s24, 16, %s6010_s18, [#allocation15]  }
  0x9b   : > { %s5777_s11 = smov [#allocation17]   ;;  %s5778_s16 = smov [#allocation20]  }
  0x9c   : > { %s898_s19 = sshll.u32 %s5777_s11, 4  ;;  %s922_s28 = sshll.u32 %s5778_s16, 4  ;;  %s899_s19 = int_to_ptr.vmem [resolvable:$true] %s898_s19  ;;  %s923_s28 = int_to_ptr.vmem [resolvable:$true] %s922_s28 }
  0x9d   : > { %s5239_s8 = scalar_lea.hbm %s6766_s6, 16 }
  0x9e   : > { %p5240_p7 = scmp.ne.s32.totalorder %s6766_s6, %s5239_s8  ;;  %p5246_p3 = scmp.lt.u32.totalorder %s5239_s8, %s6766_s6 }
  0xa0   : > { %p5242_p4 = pnand %p5240_p7, %p6016_p8 }
  0xa2   : > { %p5243_p1 = pneg %p5242_p4 }
  0xa4   : > { %p5248_p9 = pnand %p5246_p3, %p5243_p1 }
  0xa6   : > { %5251 = shalt.err (!%p5248_p9)
}
  0xa7   : > { %s5252_s1 = scalar_lea.vmem %s899_s19, 16  ;;  %s5259_s18 = scalar_lea.vmem %s899_s19, 32 }
  0xa8   : > { %p5253_p10 = scmp.ne.s32.totalorder %s899_s19, %s5252_s1  ;;  %p5260_p13 = scmp.lt.s32.totalorder %s899_s19, %s899_s19 }
  0xa9   : > { %p5261_p0 = scmp.lt.s32.totalorder %s5259_s18, %s5252_s1 }
  0xaa   : > { %p5255_p11 = pnand %p5253_p10, %p6016_p8 }
  0xab   : > { %p5262_p2 = por %p5261_p0, %p5260_p13 }
  0xac   : > { %p5256_p12 = pneg %p5255_p11 }
  0xae   : > { %p5263_p5 = pnand %p5262_p2, %p5256_p12 }
  0xb0   : > { %5266 = shalt.err (!%p5263_p5)
}
  0xb1   : > { %4950 = dma.hbm_to_vmem [thread:$0]  (!%p6004_p6), %s6766_s6, 16, %s899_s19, [#allocation18]  }
  0xb2   : > { %s5267_s8 = scalar_lea.hbm %s6765_s20, 16 }
  0xb3   : > { %p5268_p7 = scmp.ne.s32.totalorder %s6765_s20, %s5267_s8  ;;  %p5274_p3 = scmp.lt.u32.totalorder %s5267_s8, %s6765_s20 }
  0xb5   : > { %p5270_p4 = pnand %p5268_p7, %p6016_p8 }
  0xb7   : > { %p5271_p1 = pneg %p5270_p4 }
  0xb9   : > { %p5276_p9 = pnand %p5274_p3, %p5271_p1 }
  0xbb   : > { %5279 = shalt.err (!%p5276_p9)
}
  0xbc   : > { %s5280_s16 = scalar_lea.vmem %s923_s28, 16  ;;  %s5287_s10 = scalar_lea.vmem %s923_s28, 32 }
  0xbd   : > { %p5281_p10 = scmp.ne.s32.totalorder %s923_s28, %s5280_s16  ;;  %p5288_p13 = scmp.lt.s32.totalorder %s923_s28, %s923_s28 }
  0xbe   : > { %p5289_p0 = scmp.lt.s32.totalorder %s5287_s10, %s5280_s16 }
  0xbf   : > { %p5283_p11 = pnand %p5281_p10, %p6016_p8 }
  0xc0   : > { %p5290_p2 = por %p5289_p0, %p5288_p13 }
  0xc1   : > { %p5284_p12 = pneg %p5283_p11 }
  0xc3   : > { %p5291_p5 = pnand %p5290_p2, %p5284_p12 }
  0xc5   : > { %5294 = shalt.err (!%p5291_p5)
}
  0xc6   : > { %4956 = dma.hbm_to_vmem [thread:$0]  (!%p6004_p6), %s6765_s20, 16, %s923_s28, [#allocation21]  }
  0xc7   : > { %s5779_s11 = smov [#allocation23]   ;;  %s5295_s1 = scalar_lea.hbm %s6767_s4, 16 }
  0xc8   : > { %s946_s19 = sshll.u32 %s5779_s11, 4  ;;  %p5296_p7 = scmp.ne.s32.totalorder %s6767_s4, %s5295_s1  ;;  %s947_s19 = int_to_ptr.vmem [resolvable:$true] %s946_s19 }
  0xc9   : > { %p5302_p3 = scmp.lt.u32.totalorder %s5295_s1, %s6767_s4 }
  0xca   : > { %p5298_p4 = pnand %p5296_p7, %p6016_p8 }
  0xcc   : > { %p5299_p1 = pneg %p5298_p4 }
  0xce   : > { %p5304_p9 = pnand %p5302_p3, %p5299_p1 }
  0xd0   : > { %5307 = shalt.err (!%p5304_p9)
}
  0xd1   : > { %s5308_s18 = scalar_lea.vmem %s947_s19, 16  ;;  %s5315_s8 = scalar_lea.vmem %s947_s19, 32 }
  0xd2   : > { %p5309_p10 = scmp.ne.s32.totalorder %s947_s19, %s5308_s18  ;;  %p5316_p13 = scmp.lt.s32.totalorder %s947_s19, %s947_s19 }
  0xd3   : > { %p5317_p0 = scmp.lt.s32.totalorder %s5315_s8, %s5308_s18 }
  0xd4   : > { %p5311_p11 = pnand %p5309_p10, %p6016_p8 }
  0xd5   : > { %p5318_p2 = por %p5317_p0, %p5316_p13 }
  0xd6   : > { %p5312_p12 = pneg %p5311_p11 }
  0xd8   : > { %p5319_p5 = pnand %p5318_p2, %p5312_p12 }
  0xda   : > { %5322 = shalt.err (!%p5319_p5)
}
  0xdb   : > { %4962 = dma.hbm_to_vmem [thread:$0]  (!%p6004_p6), %s6767_s4, 16, %s947_s19, [#allocation24]  }
  0xdc   : > { %s4346_s28 = sadd.s32 4294967294, %s5739_s26   ;;  %s6102_s16 = sadd.s32 1, %s5739_s26  }
  0xdd   : > { %6774 = sst [smem:[#allocation67_spill]] %s6102_s16  ;;  %s97_s10 = ssub.s32 %s5739_s26, %s6102_s16 }
  0xde   : > { %s100_s11 = sadd.s32 1, %s5735_s0  ;;  %p98_p7 = scmp.eq.s32.totalorder %s97_s10, 0 }
  0xdf   : > { %p107_p4 = scmp.ne.s32.totalorder %s5735_s0, %s5731_s23  ;;  %p108_p1 = scmp.eq.s32.totalorder %s5739_s26, 0 }
  0xe0   : > { %p113_p3 = scmp.ne.s32.totalorder %s5731_s23, %s5727_s22  ;;  %p6776_p10 = scmp.eq.s32.totalorder %s5988_s2, 0 }
  0xe1   : > { %s6113_s1 = scalar_select %p98_p7, %s5735_s0, %s100_s11  }
  0xe2   : > { %p109_p9 = por %p108_p1, %p107_p4  ;;  %p6117_p11 = por %p6776_p10, %p113_p3 }
  0xe3   : > { %6775 = sst [smem:[#allocation68_spill]] %s6113_s1  ;;  %p771_p12 = scmp.eq.s32.totalorder %s5988_s2, 1 }
  0xe4   : > { %s6777_s19 = scalar_select %p6117_p11, 1, 0 }
  0xe5   : > { %p777_p13 = scmp.eq.s32.totalorder %s4346_s28, 1  ;;  %p4999_p0 = scmp.lt.s32.totalorder %s5739_s26, 2 }
  0xe6   : > { %s6124_s18 = sand.u32 1, %s5735_s0   ;;  %p6126_p2 = por %p771_p12, %p107_p4 }
  0xe7   : > { %p6130_p5 = por %p777_p13, %p113_p3  ;;  %s6726_s11 = sshll.u32 %s6124_s18, 3 }
  0xe8   : > { %s6778_s8 = scalar_select %p6126_p2, 1, 0 }
  0xe9   : > { %s6779_s10 = scalar_select %p6130_p5, 1, 0 }
  0xea   : > { %s6725_s4 = sshll.u32 %s5739_s26, 7  ;;  %p6136_p7 = pnand %p4999_p0, %p109_p9 }
  0xeb   : > { %6780 = sst [smem:[#allocation69_spill]] %s6779_s10  ;;  %s1031_s28 = sand.u32 1, %s5739_s26  }
  0xec   : > { %s6781_s6 = scalar_select %p6136_p7, 1, 0 }
  0xed   : > { %s6144_s20 = scalar_lea.hbm %s5815_s9, %s6725_s4  ;;  %s1035_s24 = scalar_lea.vmem [#allocation5], %s6726_s11 }
  0xee   : > { %s1042_s29 = sshll.u32 %s1035_s24, 4  ;;  %s5780_s1 = smov [#allocation10]   ;;  %s6148_s29 = int_to_ptr.vmem [resolvable:$true] %s1042_s29 }
  0xef   : > { %s6150_s0 = sshll.u32 %s5780_s1, 4  ;;  %s6152_s16 = scalar_lea.sflag [#allocation6], %s1031_s28  ;;  %s837_s0 = int_to_ptr.vmem [resolvable:$true] %s6150_s0 }
  0xf0   : > { %s5323_s10 = scalar_lea.hbm %s6144_s20, 128  ;;  %p6158_p1 = pneg %p6136_p7 }
  0xf1   : > { %p5324_p4 = scmp.ne.s32.totalorder %s6144_s20, %s5323_s10  ;;  %s5328_s11 = scalar_lea.hbm %s5815_s9, 256 }
  0xf2   : > { %s6782_s4 = scalar_select %p6158_p1, 1, 0 }
  0xf3   : > { %p5326_p3 = pnand %p6158_p1, %p5324_p4  ;;  %p5329_p10 = scmp.lt.u32.totalorder %s6144_s20, %s5815_s9 }
  0xf4   : > { %p5330_p12 = scmp.lt.u32.totalorder %s5328_s11, %s5323_s10  ;;  %p5332_p0 = scmp.lt.u32.totalorder %s5323_s10, %s6144_s20 }
  0xf5   : > { %p5327_p9 = pneg %p5326_p3 }
  0xf6   : > { %p5331_p13 = por %p5330_p12, %p5329_p10 }
  0xf8   : > { %p5333_p5 = por %p5332_p0, %p5331_p13 }
  0xfa   : > { %p5334_p2 = pnand %p5333_p5, %p5327_p9 }
  0xfc   : > { %5337 = shalt.err (!%p5334_p2)
}
  0xfd   : > { %s5338_s24 = scalar_lea.vmem %s6148_s29, 128  ;;  %s5781_s1 = smov [#allocation5]  }
  0xfe   : > { %p5339_p11 = scmp.ne.s32.totalorder %s6148_s29, %s5338_s24  ;;  %s5343_s28 = sshll.u32 %s5781_s1, 4  ;;  %s5344_s28 = int_to_ptr.vmem [resolvable:$false] %s5343_s28 }
  0xff   : > { %s5345_s22 = scalar_lea.vmem %s5344_s28, 256  ;;  %p5346_p4 = scmp.lt.s32.totalorder %s6148_s29, %s5344_s28 }
 0x100   : > { %p5341_p6 = pnand %p5339_p11, %p6158_p1  ;;  %p5347_p3 = scmp.lt.s32.totalorder %s5345_s22, %s5338_s24 }
 0x102   : > { %p5342_p8 = pneg %p5341_p6  ;;  %p5348_p10 = por %p5347_p3, %p5346_p4 }
 0x104   : > { %p5349_p12 = pnand %p5348_p10, %p5342_p8 }
 0x106   : > { %5352 = shalt.err (!%p5349_p12)
}
 0x107   : > { %4975 = dma.hbm_to_vmem [thread:$0]  (!%p6136_p7), %s6144_s20, 128, %s6148_s29, %s6152_s16  }
 0x108   : > { %s5353_s10 = scalar_lea.hbm %s6762_s3, 16  ;;  %p6783_p11 = scmp.ne.s32.totalorder %s6773_s25, 0 }
 0x109   : > { %p5354_p6 = scmp.ne.s32.totalorder %s6762_s3, %s5353_s10  ;;  %p5360_p9 = scmp.lt.u32.totalorder %s5353_s10, %s6762_s3 }
 0x10b   : > { %p5356_p2 = pnand %p5354_p6, %p6783_p11 }
 0x10d   : > { %p5357_p5 = pneg %p5356_p2 }
 0x10f   : > { %p5362_p8 = pnand %p5360_p9, %p5357_p5 }
 0x111   : > { %5365 = shalt.err (!%p5362_p8)
}
 0x112   : > { %s5366_s22 = scalar_lea.vmem %s837_s0, 16  ;;  %s5373_s11 = scalar_lea.vmem %s837_s0, 32 }
 0x113   : > { %p5367_p13 = scmp.ne.s32.totalorder %s837_s0, %s5366_s22  ;;  %p5374_p3 = scmp.lt.s32.totalorder %s837_s0, %s837_s0 }
 0x114   : > { %p5375_p10 = scmp.lt.s32.totalorder %s5373_s11, %s5366_s22 }
 0x115   : > { %p5369_p0 = pnand %p5367_p13, %p6783_p11 }
 0x116   : > { %p5376_p12 = por %p5375_p10, %p5374_p3 }
 0x117   : > { %p5370_p4 = pneg %p5369_p0 }
 0x119   : > { %p5377_p7 = pnand %p5376_p12, %p5370_p4 }
 0x11b   : > { %5380 = shalt.err (!%p5377_p7)
}
 0x11c   : > { %p6784_p1 = scmp.ne.s32.totalorder %s6772_s15, 0  ;;  %s5782_s29 = smov [#allocation13]  }
 0x11d   : > { %s860_s20 = sshll.u32 %s5782_s29, 4  ;;  %s5783_s24 = smov [#allocation16]   ;;  %s861_s20 = int_to_ptr.vmem [resolvable:$true] %s860_s20 }
 0x11e   : > { %4935 = dma.hbm_to_vmem [thread:$0]  (!%p6784_p1), %s6762_s3, 16, %s837_s0, [#allocation9]  }
 0x11f   : > { %s884_s1 = sshll.u32 %s5783_s24, 4  ;;  %s5381_s28 = scalar_lea.hbm %s5855_s14, 16  ;;  %s885_s1 = int_to_ptr.vmem [resolvable:$true] %s884_s1 }
 0x120   : > { %p5382_p6 = scmp.ne.s32.totalorder %s5855_s14, %s5381_s28  ;;  %p5388_p9 = scmp.lt.u32.totalorder %s5381_s28, %s5855_s14 }
 0x122   : > { %p5384_p2 = pnand %p5382_p6, %p6783_p11 }
 0x124   : > { %p5385_p5 = pneg %p5384_p2 }
 0x126   : > { %p5390_p7 = pnand %p5388_p9, %p5385_p5 }
 0x128   : > { %5393 = shalt.err (!%p5390_p7)
}
 0x129   : > { %s5394_s10 = scalar_lea.vmem %s861_s20, 16  ;;  %s5401_s0 = scalar_lea.vmem %s861_s20, 32 }
 0x12a   : > { %p5395_p8 = scmp.ne.s32.totalorder %s861_s20, %s5394_s10  ;;  %p5402_p4 = scmp.lt.s32.totalorder %s861_s20, %s861_s20 }
 0x12b   : > { %p5403_p3 = scmp.lt.s32.totalorder %s5401_s0, %s5394_s10 }
 0x12c   : > { %p5397_p13 = pnand %p5395_p8, %p6783_p11 }
 0x12d   : > { %p5404_p10 = por %p5403_p3, %p5402_p4 }
 0x12e   : > { %p5398_p0 = pneg %p5397_p13 }
 0x130   : > { %p5405_p12 = pnand %p5404_p10, %p5398_p0 }
 0x132   : > { %5408 = shalt.err (!%p5405_p12)
}
 0x133   : > { %4941 = dma.hbm_to_vmem [thread:$0]  (!%p6784_p1), %s5855_s14, 16, %s861_s20, [#allocation12]  }
 0x134   : > { %s5409_s22 = scalar_lea.hbm %s5870_s30, 512 }
 0x135   : > { %p5410_p6 = scmp.ne.s32.totalorder %s5870_s30, %s5409_s22  ;;  %p5416_p9 = scmp.lt.u32.totalorder %s5409_s22, %s5870_s30 }
 0x137   : > { %p5412_p2 = pnand %p5410_p6, %p6783_p11 }
 0x139   : > { %p5413_p5 = pneg %p5412_p2 }
 0x13b   : > { %p5418_p7 = pnand %p5416_p9, %p5413_p5 }
 0x13d   : > { %5421 = shalt.err (!%p5418_p7)
}
 0x13e   : > { %s5422_s11 = scalar_lea.vmem %s885_s1, 512  ;;  %p5430_p4 = scmp.lt.s32.totalorder %s885_s1, %s885_s1 }
 0x13f   : > { %p5423_p8 = scmp.ne.s32.totalorder %s885_s1, %s5422_s11  ;;  %p5431_p3 = scmp.lt.s32.totalorder %s5422_s11, %s5422_s11 }
 0x141   : > { %p5425_p13 = pnand %p5423_p8, %p6783_p11  ;;  %p5432_p10 = por %p5431_p3, %p5430_p4 }
 0x143   : > { %p5426_p0 = pneg %p5425_p13 }
 0x145   : > { %p5433_p12 = pnand %p5432_p10, %p5426_p0 }
 0x147   : > { %5436 = shalt.err (!%p5433_p12)
}
 0x148   : > { %s6785_s29 = smov 8   ;;  %s6786_s20 = smov 128  }
 0x149   : > { %4947 = dma.hbm_to_vmem [thread:$0]  (!%p6784_p1), %s5870_s30, 512, %s885_s1, [#allocation15], %s6786_s20, %s6786_s20, %s6785_s29  }
 0x14a   : > { %s5784_s24 = smov [#allocation19]   ;;  %s5785_s10 = smov [#allocation22]  }
 0x14b   : > { %s908_s28 = sshll.u32 %s5784_s24, 4  ;;  %s932_s0 = sshll.u32 %s5785_s10, 4  ;;  %s909_s28 = int_to_ptr.vmem [resolvable:$true] %s908_s28  ;;  %s933_s0 = int_to_ptr.vmem [resolvable:$true] %s932_s0 }
 0x14c   : > { %s5437_s22 = scalar_lea.hbm %s5880_s12, 512 }
 0x14d   : > { %p5438_p6 = scmp.ne.s32.totalorder %s5880_s12, %s5437_s22  ;;  %p5444_p9 = scmp.lt.u32.totalorder %s5437_s22, %s5880_s12 }
 0x14f   : > { %p5440_p2 = pnand %p5438_p6, %p6783_p11 }
 0x151   : > { %p5441_p5 = pneg %p5440_p2 }
 0x153   : > { %p5446_p7 = pnand %p5444_p9, %p5441_p5 }
 0x155   : > { %5449 = shalt.err (!%p5446_p7)
}
 0x156   : > { %s5450_s11 = scalar_lea.vmem %s909_s28, 512  ;;  %p5458_p4 = scmp.lt.s32.totalorder %s909_s28, %s909_s28 }
 0x157   : > { %p5451_p8 = scmp.ne.s32.totalorder %s909_s28, %s5450_s11  ;;  %p5459_p3 = scmp.lt.s32.totalorder %s5450_s11, %s5450_s11 }
 0x159   : > { %p5453_p13 = pnand %p5451_p8, %p6783_p11  ;;  %p5460_p10 = por %p5459_p3, %p5458_p4 }
 0x15b   : > { %p5454_p0 = pneg %p5453_p13 }
 0x15d   : > { %p5461_p12 = pnand %p5460_p10, %p5454_p0 }
 0x15f   : > { %5464 = shalt.err (!%p5461_p12)
}
 0x160   : > { %4953 = dma.hbm_to_vmem [thread:$0]  (!%p6784_p1), %s5880_s12, 512, %s909_s28, [#allocation18], %s6786_s20, %s6786_s20, %s6785_s29  }
 0x161   : > { %s5465_s1 = scalar_lea.hbm %s5890_s27, 512 }
 0x162   : > { %p5466_p6 = scmp.ne.s32.totalorder %s5890_s27, %s5465_s1  ;;  %p5472_p9 = scmp.lt.u32.totalorder %s5465_s1, %s5890_s27 }
 0x164   : > { %p5468_p2 = pnand %p5466_p6, %p6783_p11 }
 0x166   : > { %p5469_p5 = pneg %p5468_p2 }
 0x168   : > { %p5474_p7 = pnand %p5472_p9, %p5469_p5 }
 0x16a   : > { %5477 = shalt.err (!%p5474_p7)
}
 0x16b   : > { %s5478_s24 = scalar_lea.vmem %s933_s0, 512  ;;  %p5486_p4 = scmp.lt.s32.totalorder %s933_s0, %s933_s0 }
 0x16c   : > { %p5479_p8 = scmp.ne.s32.totalorder %s933_s0, %s5478_s24  ;;  %p5487_p3 = scmp.lt.s32.totalorder %s5478_s24, %s5478_s24 }
 0x16e   : > { %p5481_p13 = pnand %p5479_p8, %p6783_p11  ;;  %p5488_p10 = por %p5487_p3, %p5486_p4 }
 0x170   : > { %p5482_p0 = pneg %p5481_p13 }
 0x172   : > { %p5489_p12 = pnand %p5488_p10, %p5482_p0 }
 0x174   : > { %5492 = shalt.err (!%p5489_p12)
}
 0x175   : > { %4959 = dma.hbm_to_vmem [thread:$0]  (!%p6784_p1), %s5890_s27, 512, %s933_s0, [#allocation21], %s6786_s20, %s6786_s20, %s6785_s29  }
 0x176   : > { %s5786_s28 = smov [#allocation25]   ;;  %s5787_s22 = smov [#allocation26]  }
 0x177   : > { %s956_s10 = sshll.u32 %s5786_s28, 4  ;;  %s972_s11 = sshll.u32 %s5787_s22, 4  ;;  %s957_s10 = int_to_ptr.vmem [resolvable:$true] %s956_s10  ;;  %s973_s11 = int_to_ptr.vmem [resolvable:$true] %s972_s11 }
 0x178   : > { %s5493_s1 = scalar_lea.hbm %s5900_s21, 512 }
 0x179   : > { %p5494_p6 = scmp.ne.s32.totalorder %s5900_s21, %s5493_s1  ;;  %p5500_p9 = scmp.lt.u32.totalorder %s5493_s1, %s5900_s21 }
 0x17b   : > { %p5496_p2 = pnand %p5494_p6, %p6783_p11 }
 0x17d   : > { %p5497_p5 = pneg %p5496_p2 }
 0x17f   : > { %p5502_p7 = pnand %p5500_p9, %p5497_p5 }
 0x181   : > { %5505 = shalt.err (!%p5502_p7)
}
 0x182   : > { %s5506_s24 = scalar_lea.vmem %s957_s10, 512  ;;  %p5514_p4 = scmp.lt.s32.totalorder %s957_s10, %s957_s10 }
 0x183   : > { %p5507_p8 = scmp.ne.s32.totalorder %s957_s10, %s5506_s24  ;;  %p5515_p3 = scmp.lt.s32.totalorder %s5506_s24, %s5506_s24 }
 0x185   : > { %p5509_p13 = pnand %p5507_p8, %p6783_p11  ;;  %p5516_p10 = por %p5515_p3, %p5514_p4 }
 0x187   : > { %p5510_p0 = pneg %p5509_p13 }
 0x189   : > { %p5517_p12 = pnand %p5516_p10, %p5510_p0 }
 0x18b   : > { %5520 = shalt.err (!%p5517_p12)
}
 0x18c   : > { %4965 = dma.hbm_to_vmem [thread:$0]  (!%p6784_p1), %s5900_s21, 512, %s957_s10, [#allocation24], %s6786_s20, %s6786_s20, %s6785_s29  }
 0x18d   : > { %s5521_s0 = scalar_lea.hbm %s5910_s13, 512 }
 0x18e   : > { %p5522_p6 = scmp.ne.s32.totalorder %s5910_s13, %s5521_s0  ;;  %p5528_p9 = scmp.lt.u32.totalorder %s5521_s0, %s5910_s13 }
 0x190   : > { %p5524_p2 = pnand %p5522_p6, %p6783_p11 }
 0x192   : > { %p5525_p5 = pneg %p5524_p2 }
 0x194   : > { %p5530_p7 = pnand %p5528_p9, %p5525_p5 }
 0x196   : > { %5533 = shalt.err (!%p5530_p7)
}
 0x197   : > { %s5534_s28 = scalar_lea.vmem %s973_s11, 512  ;;  %p5542_p4 = scmp.lt.s32.totalorder %s973_s11, %s973_s11 }
 0x198   : > { %p5535_p8 = scmp.ne.s32.totalorder %s973_s11, %s5534_s28  ;;  %p5543_p3 = scmp.lt.s32.totalorder %s5534_s28, %s5534_s28 }
 0x19a   : > { %p5537_p13 = pnand %p5535_p8, %p6783_p11  ;;  %p5544_p10 = por %p5543_p3, %p5542_p4 }
 0x19c   : > { %p5538_p0 = pneg %p5537_p13 }
 0x19e   : > { %p5545_p12 = pnand %p5544_p10, %p5538_p0 }
 0x1a0   : > { %5548 = shalt.err (!%p5545_p12)
}
 0x1a1   : > { %s6787_s10 = sld [smem:[#allocation42_spill]]  ;;  %s6788_s25 = sshll.u32 %s5739_s26, 7 }
 0x1a2   : > { %4968 = dma.hbm_to_vmem [thread:$0]  (!%p6784_p1), %s5910_s13, 512, %s973_s11, [#allocation27], %s6786_s20, %s6786_s20, %s6785_s29  }
 0x1a3   : > { %s6789_s1 = sshll.u32 %s6124_s18, 3  ;;  %s4366_s0 = sshll.u32 %s5739_s26, 4 }
 0x1a4   : > { %s1017_s15 = scalar_lea.vmem [#allocation2], %s6789_s1  ;;  %s1014_s28 = scalar_lea.sflag [#allocation3], %s6124_s18 }
 0x1a5   : > { %s1024_s24 = sshll.u32 %s1017_s15, 4  ;;  %p6790_p6 = scmp.ne.s32.totalorder %s6782_s4, 0  ;;  %s6271_s24 = int_to_ptr.vmem [resolvable:$true] %s1024_s24 }
 0x1a7   : > { %s6267_s22 = scalar_lea.hbm %s6787_s10, %s6788_s25  ;;  %s5554_s29 = scalar_lea.hbm %s6787_s10, 256 }
 0x1a8   : > { %s5549_s3 = scalar_lea.hbm %s6267_s22, 128  ;;  %p5555_p1 = scmp.lt.u32.totalorder %s6267_s22, %s6787_s10 }
 0x1a9   : > { %p5550_p11 = scmp.ne.s32.totalorder %s6267_s22, %s5549_s3  ;;  %p5556_p9 = scmp.lt.u32.totalorder %s5554_s29, %s5549_s3 }
 0x1aa   : > { %p5558_p8 = scmp.lt.u32.totalorder %s5549_s3, %s6267_s22 }
 0x1ab   : > { %p5552_p2 = pnand %p5550_p11, %p6790_p6  ;;  %p5557_p7 = por %p5556_p9, %p5555_p1 }
 0x1ad   : > { %p5553_p5 = pneg %p5552_p2  ;;  %p5559_p13 = por %p5558_p8, %p5557_p7 }
 0x1af   : > { %p5560_p0 = pnand %p5559_p13, %p5553_p5 }
 0x1b1   : > { %5563 = shalt.err (!%p5560_p0)
}
 0x1b2   : > { %s5564_s20 = scalar_lea.vmem %s6271_s24, 128  ;;  %s5788_s11 = smov [#allocation2]  }
 0x1b3   : > { %p5565_p4 = scmp.ne.s32.totalorder %s6271_s24, %s5564_s20  ;;  %s5569_s25 = sshll.u32 %s5788_s11, 4  ;;  %s5570_s25 = int_to_ptr.vmem [resolvable:$false] %s5569_s25 }
 0x1b4   : > { %s5571_s1 = scalar_lea.vmem %s5570_s25, 256  ;;  %p5572_p12 = scmp.lt.s32.totalorder %s6271_s24, %s5570_s25 }
 0x1b5   : > { %p5567_p3 = pnand %p5565_p4, %p6790_p6  ;;  %p5573_p11 = scmp.lt.s32.totalorder %s5571_s1, %s5564_s20 }
 0x1b7   : > { %p5568_p10 = pneg %p5567_p3  ;;  %p5574_p2 = por %p5573_p11, %p5572_p12 }
 0x1b9   : > { %p5575_p1 = pnand %p5574_p2, %p5568_p10 }
 0x1bb   : > { %5578 = shalt.err (!%p5575_p1)
}
 0x1bc   : > { %p6791_p5 = scmp.ne.s32.totalorder %s6781_s6, 0  ;;  %s6792_s3 = sld [smem:[#allocation46_spill]] }
 0x1bd   : > { %s1076_s29 = scalar_lea.vmem [#allocation7], %s6124_s18 }
 0x1be   : > { %4972 = dma.hbm_to_vmem [thread:$0]  (!%p6791_p5), %s6267_s22, 128, %s6271_s24, %s1014_s28  }
 0x1bf   : > { %s1083_s20 = sshll.u32 %s1076_s29, 4  ;;  %s1084_s20 = int_to_ptr.vmem [resolvable:$true] %s1083_s20 }
 0x1c2   : > { %s6295_s15 = scalar_lea.hbm %s6792_s3, %s4366_s0  ;;  %s5584_s25 = scalar_lea.hbm %s6792_s3, 32 }
 0x1c3   : > { %s5579_s11 = scalar_lea.hbm %s6295_s15, 16  ;;  %p5585_p13 = scmp.lt.u32.totalorder %s6295_s15, %s6792_s3 }
 0x1c4   : > { %p5580_p9 = scmp.ne.s32.totalorder %s6295_s15, %s5579_s11  ;;  %p5586_p0 = scmp.lt.u32.totalorder %s5584_s25, %s5579_s11 }
 0x1c5   : > { %p5588_p3 = scmp.lt.u32.totalorder %s5579_s11, %s6295_s15 }
 0x1c6   : > { %p5582_p7 = pnand %p5580_p9, %p6790_p6  ;;  %p5587_p4 = por %p5586_p0, %p5585_p13 }
 0x1c8   : > { %p5583_p8 = pneg %p5582_p7  ;;  %p5589_p10 = por %p5588_p3, %p5587_p4 }
 0x1ca   : > { %p5590_p12 = pnand %p5589_p10, %p5583_p8 }
 0x1cc   : > { %5593 = shalt.err (!%p5590_p12)
}
 0x1cd   : > { %s5594_s22 = scalar_lea.vmem %s1084_s20, 16  ;;  %s5789_s18 = smov [#allocation7]  }
 0x1ce   : > { %p5595_p11 = scmp.ne.s32.totalorder %s1084_s20, %s5594_s22  ;;  %s5599_s24 = sshll.u32 %s5789_s18, 4  ;;  %s5600_s24 = int_to_ptr.vmem [resolvable:$false] %s5599_s24 }
 0x1cf   : > { %s5601_s0 = scalar_lea.vmem %s5600_s24, 32  ;;  %p5602_p9 = scmp.lt.s32.totalorder %s1084_s20, %s5600_s24 }
 0x1d0   : > { %p5597_p2 = pnand %p5595_p11, %p6790_p6  ;;  %p5603_p7 = scmp.lt.s32.totalorder %s5601_s0, %s5594_s22 }
 0x1d2   : > { %p5598_p1 = pneg %p5597_p2  ;;  %p5604_p5 = por %p5603_p7, %p5602_p9 }
 0x1d4   : > { %p5605_p0 = pnand %p5604_p5, %p5598_p1 }
 0x1d6   : > { %5608 = shalt.err (!%p5605_p0)
}
 0x1d7   : > { %p6793_p13 = scmp.ne.s32.totalorder %s6781_s6, 0  ;;  %p6794_p8 = scmp.ne.s32.totalorder %s6771_s7, 0 }
 0x1d8   : > { %s6315_s4 = sand.u32 (!%p6794_p8), 1, %s5731_s23   ;;  %p6795_p6 = scmp.ne.s32.totalorder (!%p6794_p8), %s6777_s19, 0 }
 0x1d9   : > { %4978 = dma.hbm_to_vmem [thread:$0]  (!%p6793_p13), %s6295_s15, 16, %s1084_s20, %s6152_s16  }
 0x1da   : > { %1092 = sbr.rel (%p6794_p8) target bundleno = 5572 (0x15c4), region = 140  ;;  %s6318_s28 = sshll.u32 (!%p6794_p8), %s6315_s4, 3 }
 0x1db   : > { %s1095_s1 = scalar_lea.sflag (!%p6794_p8), [#allocation3], %s6315_s4  ;;  %s1098_s29 = scalar_lea.vmem (!%p6794_p8), [#allocation2], %s6318_s28 }
 0x1e1   : > { %5682 = dma.done.wait (%p6795_p6), %s1095_s1, 128  }
 0x1e2   : > { %5684 = vsyncadd (%p6795_p6), %s1095_s1, 4294967168  ;;  %s1103_s6 = sand.u32 1, %s5988_s2   ;;  %s1107_s16 = scalar_lea.vmem [#allocation5], %s6318_s28 }
 0x1e3   : > { %s1104_s7 = scalar_lea.sflag [#allocation6], %s1103_s6 }
 0x1e4   : > { %5686 = dma.done.wait (%p6795_p6), %s1104_s7, 144  }
 0x1e5   : > { %5688 = vsyncadd (%p6795_p6), %s1104_s7, 4294967152  ;;  %s1115_s15 = scalar_lea.vmem [#allocation7], %s6315_s4  ;;  %p6796_p5 = scmp.eq.s32.totalorder %s5988_s2, 0 }
 0x1e7   : > { %5690 = dma.done.wait (%p6796_p5), [#allocation9], 528   ;;  %p6797_p4 = pmov %p6796_p5 }
 0x1e9   : > { %5692 = vsyncadd (%p6797_p4), [#allocation9], 4294966768  ;;  %p6798_p3 = pmov %p6797_p4 }
 0x1eb   : > { %5694 = dma.done.wait (%p6798_p3), [#allocation12], 528   ;;  %p6799_p10 = pmov %p6798_p3 }
 0x1ec   : > { %p6800_p12 = pmov %p6798_p3 }
 0x1ed   : > { %5696 = vsyncadd (%p6799_p10), [#allocation12], 4294966768 }
 0x1ee   : > { %5698 = dma.done.wait (%p6800_p12), [#allocation15], 528   ;;  %p6801_p11 = pmov %p6798_p3 }
 0x1ef   : > { %p6802_p2 = pmov %p6798_p3 }
 0x1f0   : > { %5700 = vsyncadd (%p6801_p11), [#allocation15], 4294966768 }
 0x1f1   : > { %5702 = dma.done.wait (%p6802_p2), [#allocation18], 528   ;;  %p6803_p1 = pmov %p6802_p2 }
 0x1f3   : > { %5704 = vsyncadd (%p6803_p1), [#allocation18], 4294966768  ;;  %p6804_p9 = pmov %p6803_p1 }
 0x1f4   : > { %p6805_p7 = pmov %p6803_p1 }
 0x1f5   : > { %5706 = dma.done.wait (%p6804_p9), [#allocation21], 528  }
 0x1f6   : > { %5708 = vsyncadd (%p6805_p7), [#allocation21], 4294966768  ;;  %p6806_p0 = pmov %p6803_p1 }
 0x1f8   : > { %5710 = dma.done.wait (%p6806_p0), [#allocation24], 528   ;;  %p6807_p13 = pmov %p6806_p0 }
 0x1f9   : > { %p6808_p8 = pmov %p6806_p0 }
 0x1fa   : > { %5712 = vsyncadd (%p6807_p13), [#allocation24], 4294966768 }
 0x1fb   : > { %5714 = dma.done.wait (%p6808_p8), [#allocation27], 512   ;;  %p6809_p6 = pmov %p6806_p0 }
 0x1fc   : > { %v5790_v0 = vmov 0.0|0.0   ;;  %vm5791_vm0 = vmmov 0   ;;  %v5792_v1 = vmov 0.0   ;;  %v1300_v2 = vld [vmem:[#allocation8] sm:$0xff]  ;;  %v1301_v3 = vld [vmem:[#allocation8 + $0x8] sm:$0xff]  ;;  %v1302_v4 = vld [vmem:[#allocation8 + $0x10] sm:$0xff] }
 0x1fd   : > { %5716 = vsyncadd (%p6809_p6), [#allocation27], 4294966784  ;;  %4787 = vmatprep.subr.bf16.mxu0 %v5790_v0  ;;  %4574 = vmatprep.mubr.msk.f32.mxu0 %vm5791_vm0, %v5792_v1  ;;  %v4788_v5 = vpack.c.bf16 %v1301_v3, %v1300_v2  ;;  %v1303_v6 = vld [vmem:[#allocation8 + $0x18] sm:$0xff]  ;;  %v1385_v7 = vld [vmem:[#allocation11] sm:$0xff]  ;;  %vm1311_vm1 = vcmask 261120   ;;  %s6810_s19 = sld [smem:[#allocation50_spill]] }
 0x1fe   : > { %4793 = vmatprep.subr.bf16.mxu1 %v5790_v0  ;;  %4585 = vmatprep.mubr.msk.f32.mxu1 %vm5791_vm0, %v5792_v1  ;;  %v1386_v8 = vld [vmem:[#allocation11 + $0x8] sm:$0xff]  ;;  %v1387_v9 = vld [vmem:[#allocation11 + $0x10] sm:$0xff]  ;;  %v4791_v10 = vpack.c.bf16 %v1303_v6, %v1302_v4  ;;  %v1388_v14 = vld [vmem:[#allocation11 + $0x18] sm:$0xff]  ;;  %s5793_s20 = smov 120   ;;  %s5794_s11 = smov 96   ;;  %vm1476_vm2 = vcmask 64512  }
 0x1ff   : > { %4789 = vmatpush3.bf16.msra.mxu0 %v4788_v5  ;;  %v6369_v11 = vld [vmem:[%s1098_s29] sm:$0xff]  ;;  %v6373_v12 = vld [vmem:[%s1107_s16] sm:$0xff]  ;;  %v4794_v13 = vpack.c.bf16 %v1386_v8, %v1385_v7  ;;  %v4797_v15 = vpack.c.bf16 %v1388_v14, %v1387_v9  ;;  %s5795_s25 = smov 88   ;;  %s5796_s22 = smov 80   ;;  %vm6497_vm3 = vmpackc.low %vm1476_vm2, %vm1476_vm2  ;;  %vm2817_vm4 = vcmask 130048   ;;  %vm3875_vm5 = vcmask 523264  }
 0x200   : > { %4790 = vmatprep.subr.bf16.mxu0 %v5790_v0  ;;  %v1299_v16 = vadd.f32 %v6373_v12, %v6369_v11  ;;  %v4391_v17 = vld [vmem:[#allocation10] ss:$0 sm:$0xff]  ;;  %v4393_v19 = vld [vmem:[#allocation13] ss:$0 sm:$0xff]  ;;  %s5797_s18 = smov 112   ;;  %s5798_s24 = smov 104  }
 0x201   : > { %4795 = vmatpush3.bf16.msra.mxu1 %v4794_v13  ;;  %s5799_s0 = smov 72   ;;  %s6811_s1 = sld [smem:[#allocation43_spill]] }
 0x202   : > { %4796 = vmatprep.subr.bf16.mxu1 %v5790_v0  ;;  %s6812_s29 = sld [smem:[#allocation44_spill]]  ;;  %p1275_p5 = scmp.lt.s32.totalorder %s5988_s2, 1 }
 0x203   : > { %4792 = vmatpush3.bf16.msra.mxu0 %v4791_v10  ;;  %v1470_v25 = vld [vmem:[%s6810_s19 + $0x8] sm:$0xff]  ;;  %v1469_v28 = vld [vmem:[%s6810_s19] sm:$0xff]  ;;  %v1471_v59 = vld [vmem:[%s6810_s19 + $0x10] sm:$0xff]  ;;  %p6824_p3 = scmp.ne.s32.totalorder %s6778_s8, 0 }
 0x204   : > { %4588 = vmatprep.subr.mxu0 %v5792_v1  ;;  %s1276_s6 = scalar_select %p1275_p5, %s5988_s2, 1 }
 0x205   : > { %4798 = vmatpush3.bf16.msra.mxu1 %v4797_v15 }
 0x206   : > { %4575 = vmatmul.mubr.msk.f32.vlgmr.msra.gmra.mrb[0].mxu0 %vm1311_vm1, %v1299_v16  ;;  %4603 = vmatprep.subr.mxu1 %v5792_v1  ;;  %s6476_s7 = sshll.u32 %s1276_s6, 4  ;;  %s6822_s6 = sld [smem:[#allocation56_spill]] }
 0x207   : > { %4590 = vmatprep.mubr.msk.f32.mxu0 %vm5791_vm0, %v5792_v1  ;;  %s1279_s16 = scalar_lea.vmem %s6811_s1, %s6476_s7 }
 0x208   : > { %4586 = vmatmul.mubr.msk.f32.vlgmr.msra.gmra.mrb[0].mxu1 %vm1311_vm1, %v6369_v11 }
 0x209   : > { %4605 = vmatprep.mubr.msk.f32.mxu1 %vm5791_vm0, %v5792_v1  ;;  %4604 = vmatpush3.msra.mxu1 %v1470_v25 }
 0x20a   : > { %4613 = vmatprep.subr.mxu1 %v5792_v1 }
 0x2d9   : > { %v1381_v18 = vpop.f32.mrb[0].mxu0 }
 0x2da   : > { %v6388_v20 = vadd.f32 %v4391_v17, %v1381_v18  ;;  %v4576_v21 = vpop.f32.mrb[1].mxu0 }
 0x2db   : > { %v1465_v22 = vpop.f32.mrb[0].mxu1 }
 0x2dc   : > { %1635 = vrot.lane.b32.xlu1 %v6388_v20, %s5793_s20  ;;  %1474 = vrot.lane.b32.xlu0 %v6388_v20, %s5794_s11  ;;  %v6393_v23 = vadd.f32 %v4393_v19, %v1465_v22  ;;  %v4587_v24 = vpop.f32.mrb[1].mxu1  ;;  %s1284_s11 = scalar_lea.vmem %s6812_s29, %s6476_s7  ;;  %s6821_s29 = sld [smem:[#allocation62_spill]] }
 0x2e0   : > { %1637 = vrot.lane.b32.xlu0 %v6388_v20, %s5795_s25  ;;  %1724 = vrot.lane.b32.xlu1 %v6393_v23, %s5793_s20  ;;  %s6813_s25 = sld [smem:[#allocation59_spill]] }
 0x34e   : > { %v1636_v26 = vpop.permute.xlu1 %1635  ;;  %v1475_v27 = vpop.permute.xlu0 %1474 }
 0x34f   : > { %4589 = vmatpush3.xpose.msk.msra.mxu0 %vm1476_vm2, %v1475_v27 }
 0x350   : > { %4593 = vmatprep.subr.mxu0 %v5792_v1 }
 0x352   : > { %4591 = vmatmul.mubr.msk.f32.vlgmr.msra.gmra.mrb[2].mxu0 %vm1476_vm2, %v6388_v20  ;;  %v1725_v29 = vpop.permute.xlu1 %1724  ;;  %v1638_v30 = vpop.permute.xlu0 %1637 }
 0x353   : > { %4594 = vmatpush3.msra.mxu0 %v1469_v28  ;;  %4595 = vmatprep.mubr.msk.f32.mxu0 %vm5791_vm0, %v5792_v1 }
 0x354   : > { %4598 = vmatprep.subr.mxu0 %v5792_v1  ;;  %4606 = vmatmul.mubr.msk.f32.vlgmr.msra.gmra.mrb[2].mxu1 %vm1476_vm2, %v1725_v29 }
 0x355   : > { %4615 = vmatprep.mubr.msk.f32.mxu1 %vm5791_vm0, %v5792_v1 }
 0x356   : > { %4596 = vmatmul.mubr.msk.f32.vlgmr.msra.gmra.mrb[4].mxu0 %vm1476_vm2, %v6393_v23 }
 0x357   : > { %4600 = vmatprep.mubr.msk.f32.mxu0 %vm5791_vm0, %v5792_v1 }
 0x35a   : > { %4599 = vmatpush3.xpose.msk.msra.mxu0 %vm1476_vm2, %v1638_v30  ;;  %v1472_v30 = vld [vmem:[%s6810_s19 + $0x18] sm:$0xff] }
 0x35b   : > { %4608 = vmatprep.subr.mxu0 %v5792_v1 }
 0x35d   : > { %4601 = vmatmul.mubr.msk.f32.vlgmr.msra.gmra.mrb[6].mxu0 %vm1476_vm2, %v1636_v26 }
 0x35e   : > { %4610 = vmatprep.mubr.msk.f32.mxu0 %vm5791_vm0, %v5792_v1 }
 0x425   : > { %v1547_v31 = vpop.f32.mrb[2].mxu0 }
 0x426   : > { %v4592_v32 = vpop.f32.mrb[3].mxu0  ;;  %v1551_v40 = vsel %vm1476_vm2, %v1547_v31, -inf }
 0x427   : > { %v1794_v33 = vpop.f32.mrb[2].mxu1 }
 0x428   : > { %v4607_v34 = vpop.f32.mrb[3].mxu1  ;;  %4609 = vmatpush3.msra.mxu0 %v1794_v33 }
 0x429   : > { %v1631_v35 = vpop.f32.mrb[4].mxu0  ;;  %4618 = vmatprep.subr.mxu0 %v5792_v1 }
 0x42a   : > { %v4597_v36 = vpop.f32.mrb[5].mxu0  ;;  %4614 = vmatpush3.msra.mxu1 %v1631_v35 }
 0x42b   : > { %4623 = vmatprep.subr.mxu1 %v5792_v1 }
 0x430   : > { %v1709_v37 = vpop.f32.mrb[6].mxu0 }
 0x431   : > { %v4602_v38 = vpop.f32.mrb[7].mxu0  ;;  %v1713_v39 = vsel %vm1476_vm2, %v1709_v37, -inf }
 0x432   : > { %1714 = vmax.xlane.f32.xlu0 %v1713_v39 }
 0x448   : > { %1946 = vrot.lane.b32.xlu0 %v6388_v20, %s5796_s22  ;;  %s6814_s22 = sld [smem:[#allocation60_spill]] }
 0x467   : > { %1552 = vmax.xlane.f32.xlu0 %v1551_v40  ;;  %v4411_v40 = vld [vmem:[#allocation14] ss:$0 sm:$0xff] }
 0x47d   : > { %2033 = vrot.lane.b32.xlu0 %v6393_v23, %s5797_s18 }
 0x481   : > { %2181 = vrot.lane.b32.xlu0 %v6388_v20, %s5798_s24 }
 0x4bf   : > { %v1715_v41 = vpop.xlane.xlu0 %1714 }
 0x4c0   : > { %v1716_v42 = vsub.f32 %v1709_v37, %v1715_v41 }
 0x4c2   : > { %v1717_v43 = vmul.f32 1.442695, %v1716_v42 }
 0x4c3   : > { %v1947_v46 = vpop.permute.xlu0 %1946 }
 0x4c4   : > { %5117 = vpow2.f32 %v1717_v43 }
 0x4ce   : > { %v5118_v44 = vpop.eup %5117 }
 0x4cf   : > { %v1719_v45 = vsel %vm1476_vm2, %v5118_v44, 0.0 }
 0x4d0   : > { %1720 = vadd.xlane.f32.xlu1 %v1719_v45 }
 0x4e1   : > { %1944 = vrot.lane.b32.xlu1 %v6388_v20, %s5797_s18 }
 0x4f4   : > { %v1553_v47 = vpop.xlane.xlu0 %1552 }
 0x4f5   : > { %v1554_v48 = vsub.f32 %v1547_v31, %v1553_v47 }
 0x4f7   : > { %v1555_v49 = vmul.f32 1.442695, %v1554_v48 }
 0x4f8   : > { %v2034_v60 = vpop.permute.xlu0 %2033 }
 0x4f9   : > { %5119 = vpow2.f32 %v1555_v49 }
 0x4fc   : > { %v2182_v62 = vpop.permute.xlu0 %2181 }
 0x503   : > { %v5120_v50 = vpop.eup %5119 }
 0x504   : > { %v1557_v51 = vsel %vm1476_vm2, %v5120_v50, 0.0 }
 0x505   : > { %1558 = vadd.xlane.f32.xlu1 %v1557_v51  ;;  %v2544_v51 = vld [vmem:[#allocation19] sm:$0xff] }
 0x516   : > { %2183 = vrot.lane.b32.xlu1 %v6388_v20, %s5799_s0  ;;  %s6815_s0 = sld [smem:[#allocation45_spill]] }
 0x51c   : > { %s1289_s1 = scalar_lea.vmem %s6815_s0, %s6476_s7  ;;  %s6823_s7 = sld [smem:[#allocation58_spill]] }
 0x55d   : > { %v1721_v52 = vpop.xlane.xlu1 %1720 }
 0x55e   : > { %5121 = vrcp.f32 %v1721_v52  ;;  %v2545_v52 = vld [vmem:[#allocation19 + $0x8] sm:$0xff] }
 0x561   : > { %v1945_v55 = vpop.permute.xlu1 %1944 }
 0x568   : > { %v5122_v53 = vpop.eup %5121 }
 0x569   : > { %v1723_v54 = vmul.f32 %v5122_v53, %v5118_v44  ;;  %v4805_v53 = vpack.c.bf16 %v2545_v52, %v2544_v51  ;;  %v2729_v51 = vld [vmem:[#allocation25 + $0x8] sm:$0xff] }
 0x56b   : > { %4611 = vmatmul.mubr.msk.f32.vlgmr.msra.gmra.mrb[8].mxu0 %vm1476_vm2, %v1723_v54  ;;  %v2547_v54 = vld [vmem:[#allocation19 + $0x18] sm:$0xff] }
 0x56c   : > { %4619 = vmatpush3.xpose.msk.msra.mxu0 %vm1476_vm2, %v1947_v46  ;;  %4620 = vmatprep.mubr.msk.f32.mxu0 %vm5791_vm0, %v5792_v1 }
 0x56d   : > { %4628 = vmatprep.subr.mxu0 %v5792_v1 }
 0x56f   : > { %4621 = vmatmul.mubr.msk.f32.vlgmr.msra.gmra.mrb[10].mxu0 %vm1476_vm2, %v1945_v55 }
 0x570   : > { %4630 = vmatprep.mubr.msk.f32.mxu0 %vm5791_vm0, %v5792_v1 }
 0x592   : > { %v1559_v56 = vpop.xlane.xlu1 %1558 }
 0x593   : > { %5123 = vrcp.f32 %v1559_v56  ;;  %v1292_v56 = vld [vmem:[%s1279_s16] sm:$0xff] }
 0x596   : > { %v2184_v61 = vpop.permute.xlu1 %2183 }
 0x59d   : > { %v5124_v57 = vpop.eup %5123 }
 0x59e   : > { %v1561_v58 = vmul.f32 %v5124_v57, %v5120_v50  ;;  %v1294_v57 = vld [vmem:[%s1284_s11] sm:$0xff] }
 0x5a0   : > { %4616 = vmatmul.mubr.msk.f32.vlgmr.msra.gmra.mrb[4].mxu1 %vm1476_vm2, %v1561_v58  ;;  %v1293_v58 = vld [vmem:[%s1279_s16 + $0x8] sm:$0xff]  ;;  %s4458_s16 = sshll.u32 %s5988_s2, 7 }
 0x5a1   : > { %4624 = vmatpush3.msra.mxu1 %v1471_v59  ;;  %4625 = vmatprep.mubr.msk.f32.mxu1 %vm5791_vm0, %v5792_v1  ;;  %v1295_v59 = vld [vmem:[%s1284_s11 + $0x8] sm:$0xff]  ;;  %s6638_s11 = scalar_lea.hbm %s5965_s17, %s4458_s16 }
 0x5a2   : > { %4633 = vmatprep.subr.mxu1 %v5792_v1 }
 0x5a4   : > { %4626 = vmatmul.mubr.msk.f32.vlgmr.msra.gmra.mrb[6].mxu1 %vm1476_vm2, %v2034_v60  ;;  %v2458_v60 = vadd.f32 %v1294_v57, %v1292_v56 }
 0x5a5   : > { %4635 = vmatprep.mubr.msk.f32.mxu1 %vm5791_vm0, %v5792_v1 }
 0x5a8   : > { %4634 = vmatpush3.xpose.msk.msra.mxu1 %vm1476_vm2, %v2184_v61  ;;  %v2459_v61 = vadd.f32 %v1295_v59, %v1293_v58 }
 0x5a9   : > { %4643 = vmatprep.subr.mxu1 %v5792_v1 }
 0x5ab   : > { %4636 = vmatmul.mubr.msk.f32.vlgmr.msra.gmra.mrb[8].mxu1 %vm1476_vm2, %v2182_v62  ;;  %v2460_v62 = vld [vmem:[#allocation16] sm:$0xff] }
 0x5ac   : > { %4645 = vmatprep.mubr.msk.f32.mxu1 %vm5791_vm0, %v5792_v1 }
 0x63e   : > { %v1867_v63 = vpop.f32.mrb[8].mxu0 }
 0x63f   : > { %v4612_v2 = vpop.f32.mrb[9].mxu0 }
 0x642   : > { %v2018_v3 = vpop.f32.mrb[10].mxu0 }
 0x643   : > { %v4622_v4 = vpop.f32.mrb[11].mxu0  ;;  %v2022_v5 = vsel %vm1476_vm2, %v2018_v3, -inf }
 0x644   : > { %2023 = vmax.xlane.f32.xlu1 %v2022_v5  ;;  %v2463_v4 = vld [vmem:[#allocation16 + $0x18] sm:$0xff] }
 0x673   : > { %v1940_v6 = vpop.f32.mrb[4].mxu1 }
 0x674   : > { %v1941_v7 = vadd.f32 %v1940_v6, %v1867_v63  ;;  %v4617_v8 = vpop.f32.mrb[5].mxu1  ;;  %v2461_v63 = vld [vmem:[#allocation16 + $0x8] sm:$0xff] }
 0x675   : > { %v4800_v2 = vpack.c.bf16 %v2461_v63, %v2460_v62 }
 0x677   : > { %v2103_v9 = vpop.f32.mrb[6].mxu1 }
 0x678   : > { %v4627_v10 = vpop.f32.mrb[7].mxu1  ;;  %4629 = vmatpush3.msra.mxu0 %v2103_v9 }
 0x679   : > { %4638 = vmatprep.subr.mxu0 %v5792_v1  ;;  %v4412_v10 = vld [vmem:[%s6813_s25] ss:$0 sm:$0xff] }
 0x67e   : > { %v2255_v13 = vpop.f32.mrb[8].mxu1 }
 0x67f   : > { %v4637_v14 = vpop.f32.mrb[9].mxu1  ;;  %v2259_v15 = vsel %vm1476_vm2, %v2255_v13, -inf }
 0x680   : > { %2260 = vmax.xlane.f32.xlu1 %v2259_v15  ;;  %v4413_v14 = vld [vmem:[%s6814_s22] ss:$0 sm:$0xff]  ;;  %s3987_s22 = scalar_lea.sflag [#allocation30], %s6315_s4 }
 0x6d1   : > { %v2024_v16 = vpop.xlane.xlu1 %2023 }
 0x6d2   : > { %v2025_v17 = vsub.f32 %v2018_v3, %v2024_v16  ;;  %v2462_v3 = vld [vmem:[#allocation16 + $0x10] sm:$0xff] }
 0x6d3   : > { %v4803_v5 = vpack.c.bf16 %v2463_v4, %v2462_v3 }
 0x6d4   : > { %v2026_v18 = vmul.f32 1.442695, %v2025_v17 }
 0x6d6   : > { %5125 = vpow2.f32 %v2026_v18  ;;  %v4416_v18 = vld [vmem:[#allocation20] ss:$0 sm:$0xff] }
 0x6e0   : > { %v5126_v19 = vpop.eup %5125 }
 0x6e1   : > { %v2028_v20 = vsel %vm1476_vm2, %v5126_v19, 0.0 }
 0x6e2   : > { %2029 = vadd.xlane.f32.xlu0 %v2028_v20 }
 0x6f8   : > { %2270 = vrot.lane.b32.xlu0 %v6393_v23, %s5798_s24 }
 0x70d   : > { %v2261_v21 = vpop.xlane.xlu1 %2260 }
 0x70e   : > { %v2262_v22 = vsub.f32 %v2255_v13, %v2261_v21 }
 0x710   : > { %v2263_v24 = vmul.f32 1.442695, %v2262_v22 }
 0x712   : > { %5127 = vpow2.f32 %v2263_v24 }
 0x71c   : > { %v5128_v25 = vpop.eup %5127 }
 0x71d   : > { %v2265_v26 = vsel %vm1476_vm2, %v5128_v25, 0.0 }
 0x71e   : > { %2266 = vadd.xlane.f32.xlu1 %v2265_v26 }
 0x76f   : > { %v2030_v27 = vpop.xlane.xlu0 %2029 }
 0x770   : > { %5129 = vrcp.f32 %v2030_v27  ;;  %v2637_v27 = vld [vmem:[#allocation22 + $0x8] sm:$0xff] }
 0x773   : > { %v2271_v23 = vpop.permute.xlu0 %2270 }
 0x77a   : > { %v5130_v28 = vpop.eup %5129 }
 0x77b   : > { %v2032_v29 = vmul.f32 %v5130_v28, %v5126_v19  ;;  %v2638_v28 = vld [vmem:[#allocation22 + $0x10] sm:$0xff] }
 0x77d   : > { %4631 = vmatmul.mubr.msk.f32.vlgmr.msra.gmra.mrb[12].mxu0 %vm1476_vm2, %v2032_v29 }
 0x77e   : > { %4639 = vmatpush3.msra.mxu0 %v1472_v30  ;;  %4640 = vmatprep.mubr.msk.f32.mxu0 %vm5791_vm0, %v5792_v1  ;;  %v2639_v30 = vld [vmem:[#allocation22 + $0x18] sm:$0xff] }
 0x77f   : > { %4799 = vmatprep.subr.bf16.mxu0 %v5790_v0 }
 0x781   : > { %4641 = vmatmul.mubr.msk.f32.vlgmr.msra.gmra.mrb[14].mxu0 %vm1476_vm2, %v2271_v23  ;;  %v1296_v23 = vld [vmem:[%s1289_s1] sm:$0xff] }
 0x782   : > { %4656 = vmatprep.mubr.msk.f32.mxu0 %vm5791_vm0, %v5792_v1  ;;  %4801 = vmatpush3.bf16.msra.mxu0 %v4800_v2 }
 0x783   : > { %4802 = vmatprep.subr.bf16.mxu0 %v5790_v0 }
 0x786   : > { %4804 = vmatpush3.bf16.msra.mxu0 %v4803_v5 }
 0x7ab   : > { %v2267_v31 = vpop.xlane.xlu1 %2266 }
 0x7ac   : > { %5131 = vrcp.f32 %v2267_v31  ;;  %v4817_v31 = vpack.c.bf16 %v2639_v30, %v2638_v28 }
 0x7b6   : > { %v5132_v33 = vpop.eup %5131 }
 0x7b7   : > { %v2269_v36 = vmul.f32 %v5132_v33, %v5128_v25 }
 0x850   : > { %v2176_v32 = vpop.f32.mrb[12].mxu0 }
 0x851   : > { %v2180_v34 = vadd.f32 %v2176_v32, %v1941_v7  ;;  %v4632_v35 = vpop.f32.mrb[13].mxu0  ;;  %v1297_v32 = vld [vmem:[%s1289_s1 + $0x8] sm:$0xff]  ;;  %s5800_s1 = smov [#allocation29]  }
 0x854   : > { %v2340_v37 = vpop.f32.mrb[14].mxu0 }
 0x855   : > { %v4642_v38 = vpop.f32.mrb[15].mxu0  ;;  %4644 = vmatpush3.msra.mxu1 %v2340_v37 }
 0x856   : > { %4646 = vmatmul.mubr.msk.f32.vlgmr.msra.gmra.mrb[10].mxu1 %vm1476_vm2, %v2269_v36  ;;  %4806 = vmatprep.subr.bf16.mxu1 %v4805_v53  ;;  %v4414_v36 = vld [vmem:[#allocation17] ss:$0 sm:$0xff] }
 0x857   : > { %4808 = vmatpush3.bf16.msra.mxu1 %v4805_v53  ;;  %4667 = vmatprep.mubr.msk.f32.mxu1 %vm1311_vm1, %v2458_v60  ;;  %v6545_v53 = vld [vmem:[%s1115_s15] ss:$0 sm:$0xff]  ;;  %s6818_s15 = sld [smem:[#allocation55_spill]] }
 0x929   : > { %v2413_v39 = vpop.f32.mrb[10].mxu1 }
 0x92a   : > { %v2417_v41 = vadd.f32 %v2413_v39, %v2180_v34  ;;  %v4647_v42 = vpop.f32.mrb[11].mxu1 }
 0x92b   : > { %v4419_v42 = vld [vmem:[#allocation23] ss:$0 sm:$0xff] }
 0x92c   : > { %v2425_v43 = vadd.f32 %v4411_v40, %v2417_v41  ;;  %v2728_v41 = vld [vmem:[#allocation25] sm:$0xff] }
 0x92e   : > { %v2426_v44 = vadd.f32 %v2425_v43, %v6369_v11  ;;  %v2546_v11 = vld [vmem:[#allocation19 + $0x10] sm:$0xff] }
 0x92f   : > { %v4809_v55 = vpack.c.bf16 %v2547_v54, %v2546_v11 }
 0x930   : > { %v2429_v45 = vsel %vm1311_vm1, %v2426_v44, 0.0 }
 0x931   : > { %2430 = vadd.xlane.f32.xlu1 %v2429_v45  ;;  %4810 = vmatprep.subr.bf16.mxu1 %v4809_v55 }
 0x932   : > { %4812 = vmatpush3.bf16.msra.mxu1 %v4809_v55 }
 0x933   : > { %4821 = vmatprep.subr.bf16.mxu1 %v5790_v0 }
 0x935   : > { %4668 = vmatmul.mubr.msk.f32.vlgmr.msra.gmra.mrb[12].mxu1 %vm1311_vm1, %v2459_v61 }
 0x936   : > { %4685 = vmatprep.mubr.msk.f32.mxu1 %vm5791_vm0, %v5792_v1 }
 0x9be   : > { %v2431_v46 = vpop.xlane.xlu1 %2430 }
 0x9bf   : > { %v2433_v47 = vmul.f32 0.03125, %v2431_v46 }
 0x9c1   : > { %v2434_v48 = vsub.f32 %v2426_v44, %v2433_v47 }
 0x9c3   : > { %v2435_v49 = vmul.f32 %v2434_v48, %v2434_v48 }
 0x9c5   : > { %v2436_v50 = vsel %vm1311_vm1, %v2435_v49, 0.0 }
 0x9c6   : > { %2437 = vadd.xlane.f32.xlu1 %v2436_v50 }
 0xa08   : > { %v4669_v19 = vpop.f32.mrb[12].mxu1 }
 0xa09   : > { %v2633_v20 = vadd.f32 %v4669_v19, %v4416_v18  ;;  %v2627_v21 = vpop.f32.mrb[13].mxu1 }
 0xa0a   : > { %v2628_v22 = vadd.f32 %v4416_v18, %v2627_v21 }
 0xa0c   : > { %v4822_v25 = vpack.c.bf16 %v2633_v20, %v2628_v22  ;;  %v6501_v26 = vpack.i.bf16 %v2633_v20, %v2628_v22 }
 0xa0e   : > { %5103 = vrot.lane.b32.xlu1 %v6501_v26, %s5793_s20  ;;  %4824 = vmatpush3.bf16.xpose.msk.msra.mxu1 %vm6497_vm3, %v4822_v25 }
 0xa0f   : > { %4825 = vmatprep.subr.bf16.mxu1 %v5790_v0 }
 0xa53   : > { %v2438_v6 = vpop.xlane.xlu1 %2437 }
 0xa54   : > { %v2439_v7 = vmul.f32 0.03125, %v2438_v6 }
 0xa56   : > { %v2440_v8 = vadd.f32 1e-05, %v2439_v7 }
 0xa58   : > { %5133 = vrsqrt.f32 %v2440_v8 }
 0xa62   : > { %v5134_v9 = vpop.eup %5133 }
 0xa63   : > { %v2442_v13 = vmul.f32 %v5134_v9, %v2434_v48 }
 0xa65   : > { %v2449_v15 = vmul.f32 %v4412_v10, %v2442_v13 }
 0xa67   : > { %v2456_v16 = vadd.f32 %v4413_v14, %v2449_v15 }
 0xa69   : > { %v6491_v17 = vadd.f32 %v2456_v16, %v6373_v12  ;;  %v2636_v12 = vld [vmem:[#allocation22] sm:$0xff]  ;;  %v2730_v16 = vld [vmem:[#allocation25 + $0x10] sm:$0xff] }
 0xa6a   : > { %v4813_v29 = vpack.c.bf16 %v2637_v27, %v2636_v12 }
 0xa6b   : > { %4657 = vmatmul.mubr.msk.f32.vlgmr.msra.gmra.mrb[16].mxu0 %vm1311_vm1, %v6491_v17 }
 0xa6c   : > { %4678 = vmatprep.mubr.msk.f32.mxu0 %vm1311_vm1, %v1296_v23  ;;  %4814 = vmatprep.subr.bf16.mxu0 %v4813_v29 }
 0xa6d   : > { %4816 = vmatpush3.bf16.msra.mxu0 %v4813_v29 }
 0xa6e   : > { %4818 = vmatprep.subr.bf16.mxu0 %v4817_v31 }
 0xa71   : > { %4820 = vmatpush3.bf16.msra.mxu0 %v4817_v31 }
 0xa72   : > { %4688 = vmatprep.subr.mxu0 %v2728_v41 }
 0xa74   : > { %4679 = vmatmul.mubr.msk.f32.vlgmr.msra.gmra.mrb[18].mxu0 %vm1311_vm1, %v1297_v32 }
 0xa75   : > { %4689 = vmatpush3.msra.mxu0 %v2728_v41 }
 0xa76   : > { %4700 = vmatprep.subr.mxu0 %v2729_v51 }
 0xa80   : > { %v5104_v33 = vpop.permute.xlu1 %5103 }
 0xa81   : > { %v5106_v34 = vunpack.i.h.bf16 %v5104_v33  ;;  %v5105_v35 = vunpack.i.l.bf16 %v5104_v33 }
 0xa83   : > { %v4826_v38 = vpack.c.bf16 %v5106_v34, %v5105_v35 }
 0xb3e   : > { %v2540_v37 = vpop.f32.mrb[16].mxu0 }
 0xb3f   : > { %v6512_v39 = vadd.f32 %v4414_v36, %v2540_v37  ;;  %v4658_v40 = vpop.f32.mrb[17].mxu0 }
 0xb41   : > { %2911 = vrot.lane.b32.xlu0 %v6512_v39, %s5793_s20  ;;  %4686 = vmatmul.mubr.msk.f32.vlgmr.msra.gmra.mrb[14].mxu1 %vm1476_vm2, %v6512_v39 }
 0xb42   : > { %4828 = vmatpush3.bf16.xpose.msk.msra.mxu1 %vm6497_vm3, %v4826_v38  ;;  %4697 = vmatprep.mubr.msk.f32.mxu1 %vm5791_vm0, %v5792_v1 }
 0xb43   : > { %4832 = vmatprep.subr.bf16.mxu1 %v5790_v0 }
 0xb47   : > { %v4680_v43 = vpop.f32.mrb[18].mxu0 }
 0xb48   : > { %v6523_v44 = vadd.f32 %v4680_v43, %v4419_v42  ;;  %v2719_v45 = vpop.f32.mrb[19].mxu0 }
 0xb49   : > { %v6525_v46 = vadd.f32 %v4419_v42, %v2719_v45 }
 0xb4b   : > { %3005 = vrot.lane.b32.xlu0 %v6525_v46, %s5793_s20  ;;  %4690 = vmatprep.mubr.msk.f32.mxu0 %vm1476_vm2, %v6525_v46 }
 0xb4c   : > { %4691 = vmatmul.mubr.msk.f32.vlgmr.msra.gmra.mrb[20].mxu0 %vm1476_vm2, %v6523_v44 }
 0xb4d   : > { %4701 = vmatpush3.msra.mxu0 %v2729_v51 }
 0xb4e   : > { %4829 = vmatprep.subr.bf16.mxu0 %v5790_v0 }
 0xb4f   : > { %3007 = vrot.lane.b32.xlu0 %v6523_v44, %s5793_s20  ;;  %s1274_s20 = scalar_lea.vmem [#allocation29], %s6318_s28 }
 0xb50   : > { %s4013_s25 = sshll.u32 %s1274_s20, 4  ;;  %s4014_s25 = int_to_ptr.vmem [resolvable:$true] %s4013_s25 }
 0xb51   : > { %s5609_s0 = scalar_lea.vmem %s4014_s25, 128 }
 0xb52   : > { %p5610_p4 = scmp.ne.s32.totalorder %s4014_s25, %s5609_s0 }
 0xb54   : > { %p5611_p10 = pnand %p5610_p4, %p6824_p3 }
 0xb56   : > { %p5612_p12 = pneg %p5611_p10 }
 0xbb3   : > { %v2912_v47 = vpop.permute.xlu0 %2911 }
 0xbb4   : > { %4698 = vmatmul.mubr.msk.f32.vlgmr.msra.gmra.mrb[16].mxu1 %vm1476_vm2, %v2912_v47 }
 0xbb5   : > { %4716 = vmatprep.mubr.msk.f32.mxu1 %vm5791_vm0, %v5792_v1 }
 0xbbd   : > { %v3006_v50 = vpop.permute.xlu0 %3005 }
 0xbbe   : > { %4702 = vmatprep.mubr.msk.f32.mxu0 %vm1476_vm2, %v3006_v50 }
 0xbc1   : > { %v3008_v52 = vpop.permute.xlu0 %3007 }
 0xbc2   : > { %4703 = vmatmul.mubr.msk.f32.vlgmr.msra.gmra.mrb[22].mxu0 %vm1476_vm2, %v3008_v52 }
 0xbc3   : > { %4709 = vmatprep.mubr.msk.f32.mxu0 %vm5791_vm0, %v5792_v1 }
 0xc14   : > { %v2813_v48 = vpop.f32.mrb[14].mxu1 }
 0xc15   : > { %v4687_v49 = vpop.f32.mrb[15].mxu1  ;;  %v2814_v58 = vadd.f32 %v6545_v53, %v2813_v48 }
 0xc17   : > { %v2818_v61 = vsel %vm2817_vm4, %v2814_v58, -inf }
 0xc1f   : > { %v4692_v57 = vpop.f32.mrb[20].mxu0 }
 0xc20   : > { %v2902_v59 = vpop.f32.mrb[21].mxu0 }
 0xc21   : > { %v4833_v60 = vpack.c.bf16 %v4692_v57, %v2902_v59  ;;  %v2731_v57 = vld [vmem:[#allocation25 + $0x18] sm:$0xff] }
 0xc23   : > { %4834 = vmatpush3.bf16.msra.mxu1 %v4833_v60 }
 0xc24   : > { %4726 = vmatprep.subr.mxu1 %v2730_v16 }
 0xc87   : > { %v2989_v11 = vpop.f32.mrb[16].mxu1 }
 0xc88   : > { %v2990_v54 = vadd.f32 %v6545_v53, %v2989_v11  ;;  %v4699_v55 = vpop.f32.mrb[17].mxu1 }
 0xc8a   : > { %v2993_v56 = vsel %vm2817_vm4, %v2990_v54, -inf }
 0xc8b   : > { %2994 = vmax.xlane.f32.xlu0 %v2993_v56 }
 0xc95   : > { %v4704_v5 = vpop.f32.mrb[22].mxu0 }
 0xc96   : > { %v3079_v6 = vpop.f32.mrb[23].mxu0 }
 0xc97   : > { %v4830_v7 = vpack.c.bf16 %v4704_v5, %v3079_v6 }
 0xc99   : > { %4831 = vmatpush3.bf16.msra.mxu0 %v4830_v7 }
 0xc9a   : > { %4835 = vmatprep.subr.bf16.mxu0 %v5790_v0 }
 0xca1   : > { %5108 = vrot.lane.b32.xlu0 %v6501_v26, %s5797_s18 }
 0xcc0   : > { %2819 = vmax.xlane.f32.xlu0 %v2818_v61 }
 0xcd6   : > { %3328 = vrot.lane.b32.xlu0 %v6525_v46, %s5797_s18 }
 0xcda   : > { %5113 = vrot.lane.b32.xlu0 %v6501_v26, %s5798_s24 }
 0xd18   : > { %v2995_v62 = vpop.xlane.xlu0 %2994 }
 0xd19   : > { %v2996_v63 = vsub.f32 %v2990_v54, %v2995_v62 }
 0xd1b   : > { %v2997_v2 = vmul.f32 1.442695, %v2996_v63 }
 0xd1c   : > { %v5109_v8 = vpop.permute.xlu0 %5108 }
 0xd1d   : > { %5135 = vpow2.f32 %v2997_v2  ;;  %v5111_v20 = vunpack.i.h.bf16 %v5109_v8  ;;  %v5110_v21 = vunpack.i.l.bf16 %v5109_v8 }
 0xd1f   : > { %v4836_v26 = vpack.c.bf16 %v5111_v20, %v5110_v21  ;;  %v4447_v20 = vld [vmem:[%s6818_s15] ss:$0 sm:$0xff]  ;;  %s5613_s15 = sshll.u32 %s5800_s1, 4  ;;  %s5614_s15 = int_to_ptr.vmem [resolvable:$false] %s5613_s15 }
 0xd20   : > { %p5616_p11 = scmp.lt.s32.totalorder %s4014_s25, %s5614_s15 }
 0xd27   : > { %v5136_v3 = vpop.eup %5135 }
 0xd28   : > { %v2999_v4 = vsel %vm2817_vm4, %v5136_v3, 0.0 }
 0xd29   : > { %3000 = vadd.xlane.f32.xlu1 %v2999_v4 }
 0xd3a   : > { %3234 = vrot.lane.b32.xlu1 %v6512_v39, %s5797_s18 }
 0xd4d   : > { %v2820_v9 = vpop.xlane.xlu0 %2819 }
 0xd4e   : > { %v2821_v10 = vsub.f32 %v2814_v58, %v2820_v9 }
 0xd50   : > { %v2822_v13 = vmul.f32 1.442695, %v2821_v10 }
 0xd51   : > { %v3329_v19 = vpop.permute.xlu0 %3328 }
 0xd52   : > { %5137 = vpow2.f32 %v2822_v13 }
 0xd55   : > { %v5114_v12 = vpop.permute.xlu0 %5113 }
 0xd56   : > { %v5116_v27 = vunpack.i.h.bf16 %v5114_v12  ;;  %v5115_v28 = vunpack.i.l.bf16 %v5114_v12 }
 0xd58   : > { %v4843_v29 = vpack.c.bf16 %v5116_v27, %v5115_v28 }
 0xd5c   : > { %v5138_v14 = vpop.eup %5137 }
 0xd5d   : > { %v2824_v15 = vsel %vm2817_vm4, %v5138_v14, 0.0 }
 0xd5e   : > { %2825 = vadd.xlane.f32.xlu1 %v2824_v15 }
 0xd6f   : > { %3330 = vrot.lane.b32.xlu1 %v6523_v44, %s5797_s18  ;;  %s6819_s18 = sld [smem:[#allocation57_spill]] }
 0xd73   : > { %3485 = vrot.lane.b32.xlu1 %v6512_v39, %s5798_s24 }
 0xdb6   : > { %v3001_v18 = vpop.xlane.xlu1 %3000 }
 0xdb7   : > { %5139 = vrcp.f32 %v3001_v18 }
 0xdba   : > { %v3235_v30 = vpop.permute.xlu1 %3234 }
 0xdc1   : > { %v5140_v22 = vpop.eup %5139 }
 0xdc2   : > { %v3003_v25 = vmul.f32 %v5140_v22, %v5136_v3 }
 0xdc4   : > { %4710 = vmatmul.mubr.msk.f32.vlgmr.msra.gmra.mrb[24].mxu0 %vm2817_vm4, %v3003_v25 }
 0xdc5   : > { %4838 = vmatpush3.bf16.xpose.msk.msra.mxu0 %vm6497_vm3, %v4836_v26  ;;  %4723 = vmatprep.mubr.msk.f32.mxu0 %vm5791_vm0, %v5792_v1 }
 0xdc6   : > { %4842 = vmatprep.subr.bf16.mxu0 %v5790_v0 }
 0xdcc   : > { %4724 = vmatmul.mubr.msk.f32.vlgmr.msra.gmra.mrb[26].mxu0 %vm1476_vm2, %v3235_v30 }
 0xdcd   : > { %4845 = vmatpush3.bf16.xpose.msk.msra.mxu0 %vm6497_vm3, %v4843_v29  ;;  %4742 = vmatprep.mubr.msk.f32.mxu0 %vm5791_vm0, %v5792_v1 }
 0xdce   : > { %4849 = vmatprep.subr.bf16.mxu0 %v5790_v0 }
 0xdeb   : > { %v2826_v23 = vpop.xlane.xlu1 %2825 }
 0xdec   : > { %5141 = vrcp.f32 %v2826_v23  ;;  %v3775_v23 = vld [vmem:[#allocation26] sm:$0xff] }
 0xdef   : > { %v3331_v31 = vpop.permute.xlu1 %3330 }
 0xdf3   : > { %v3486_v32 = vpop.permute.xlu1 %3485 }
 0xdf4   : > { %4743 = vmatmul.mubr.msk.f32.vlgmr.msra.gmra.mrb[28].mxu0 %vm1476_vm2, %v3486_v32 }
 0xdf5   : > { %4765 = vmatprep.mubr.msk.f32.mxu0 %vm5791_vm0, %v5792_v1 }
 0xdf6   : > { %v5142_v33 = vpop.eup %5141 }
 0xdf7   : > { %v2828_v34 = vmul.f32 %v5142_v33, %v5138_v14  ;;  %v3778_v33 = vld [vmem:[#allocation26 + $0x18] sm:$0xff] }
 0xdf9   : > { %v3004_v35 = vadd.f32 %v3003_v25, %v2828_v34  ;;  %4717 = vmatmul.mubr.msk.f32.vlgmr.msra.gmra.mrb[18].mxu1 %vm2817_vm4, %v2828_v34 }
 0xdfa   : > { %4728 = vmatprep.mubr.msk.f32.mxu1 %vm1476_vm2, %v3329_v19  ;;  %4727 = vmatpush3.msra.mxu1 %v2730_v16 }
 0xdfb   : > { %4839 = vmatprep.subr.bf16.mxu1 %v5790_v0 }
 0xdfd   : > { %4729 = vmatmul.mubr.msk.f32.vlgmr.msra.gmra.mrb[20].mxu1 %vm1476_vm2, %v3331_v31  ;;  %v3776_v31 = vld [vmem:[#allocation26 + $0x8] sm:$0xff] }
 0xdfe   : > { %4735 = vmatprep.mubr.msk.f32.mxu1 %vm5791_vm0, %v5792_v1  ;;  %v4850_v32 = vpack.c.bf16 %v3776_v31, %v3775_v23 }
 0xe00   : > { %4851 = vmatpush3.bf16.msra.mxu0 %v4850_v32 }
 0xe01   : > { %4852 = vmatprep.subr.bf16.mxu0 %v5790_v0 }
 0xe97   : > { %v3157_v24 = vpop.f32.mrb[24].mxu0 }
 0xe98   : > { %v4711_v36 = vpop.f32.mrb[25].mxu0 }
 0xe99   : > { %v3862_v36 = vld [vmem:[%s6819_s18 + $0x10] sm:$0xff] }
 0xe9f   : > { %v3312_v37 = vpop.f32.mrb[26].mxu0 }
 0xea0   : > { %v3313_v38 = vadd.f32 %v6545_v53, %v3312_v37  ;;  %v4725_v39 = vpop.f32.mrb[27].mxu0 }
 0xea2   : > { %v3316_v40 = vsel %vm2817_vm4, %v3313_v38, -inf }
 0xea3   : > { %3317 = vmax.xlane.f32.xlu0 %v3316_v40  ;;  %v3864_v40 = vld [vmem:[%s6819_s18 + $0x20] sm:$0xff] }
 0xeb9   : > { %3579 = vrot.lane.b32.xlu0 %v6525_v46, %s5798_s24 }
 0xec7   : > { %v3563_v41 = vpop.f32.mrb[28].mxu0 }
 0xec8   : > { %v4744_v42 = vpop.f32.mrb[29].mxu0  ;;  %v3564_v51 = vadd.f32 %v6545_v53, %v3563_v41  ;;  %v3865_v41 = vld [vmem:[%s6819_s18 + $0x28] sm:$0xff] }
 0xec9   : > { %v4862_v42 = vpack.c.bf16 %v3865_v41, %v3864_v40 }
 0xeca   : > { %v3567_v52 = vsel %vm2817_vm4, %v3564_v51, -inf }
 0xecc   : > { %v3230_v43 = vpop.f32.mrb[18].mxu1 }
 0xecd   : > { %v3231_v45 = vadd.f32 %v3230_v43, %v3157_v24  ;;  %v4718_v47 = vpop.f32.mrb[19].mxu1  ;;  %v3861_v24 = vld [vmem:[%s6819_s18 + $0x8] sm:$0xff] }
 0xed0   : > { %v4730_v48 = vpop.f32.mrb[20].mxu1 }
 0xed1   : > { %v3402_v49 = vpop.f32.mrb[21].mxu1 }
 0xed2   : > { %v4840_v50 = vpack.c.bf16 %v4730_v48, %v3402_v49 }
 0xed4   : > { %4841 = vmatpush3.bf16.msra.mxu1 %v4840_v50 }
 0xed5   : > { %4745 = vmatprep.subr.mxu1 %v2731_v57 }
 0xed8   : > { %3568 = vmax.xlane.f32.xlu0 %v3567_v52 }
 0xf30   : > { %v3318_v11 = vpop.xlane.xlu0 %3317 }
 0xf31   : > { %v3319_v54 = vsub.f32 %v3313_v38, %v3318_v11  ;;  %v3863_v38 = vld [vmem:[%s6819_s18 + $0x18] sm:$0xff] }
 0xf32   : > { %v4859_v39 = vpack.c.bf16 %v3863_v38, %v3862_v36 }
 0xf33   : > { %v3320_v55 = vmul.f32 1.442695, %v3319_v54  ;;  %v3866_v54 = vld [vmem:[%s6819_s18 + $0x30] sm:$0xff] }
 0xf34   : > { %v3580_v58 = vpop.permute.xlu0 %3579 }
 0xf35   : > { %5143 = vpow2.f32 %v3320_v55  ;;  %v3867_v55 = vld [vmem:[%s6819_s18 + $0x38] sm:$0xff] }
 0xf3f   : > { %v5144_v56 = vpop.eup %5143 }
 0xf40   : > { %v3322_v46 = vsel %vm2817_vm4, %v5144_v56, 0.0 }
 0xf41   : > { %3323 = vadd.xlane.f32.xlu1 %v3322_v46  ;;  %v4450_v46 = vld [vmem:[%s6822_s6] ss:$0 sm:$0xff] }
 0xf52   : > { %3581 = vrot.lane.b32.xlu1 %v6523_v44, %s5798_s24  ;;  %s6820_s24 = sld [smem:[#allocation61_spill]] }
 0xf58   : > { %v4448_v49 = vld [vmem:[%s6820_s24] ss:$0 sm:$0xff]  ;;  %s5615_s24 = scalar_lea.vmem %s5614_s15, 256 }
 0xf59   : > { %p5617_p2 = scmp.lt.s32.totalorder %s5615_s24, %s5609_s0 }
 0xf5b   : > { %p5618_p1 = por %p5617_p2, %p5616_p11 }
 0xf5d   : > { %p5619_p9 = pnand %p5618_p1, %p5612_p12 }
 0xf65   : > { %v3569_v59 = vpop.xlane.xlu0 %3568 }
 0xf66   : > { %v3570_v53 = vsub.f32 %v3564_v51, %v3569_v59  ;;  %v4449_v51 = vld [vmem:[%s6821_s29] ss:$0 sm:$0xff] }
 0xf68   : > { %v3571_v60 = vmul.f32 1.442695, %v3570_v53  ;;  %v4452_v53 = vld [vmem:[%s6823_s7] ss:$0 sm:$0xff] }
 0xf6a   : > { %5145 = vpow2.f32 %v3571_v60 }
 0xf74   : > { %v5146_v61 = vpop.eup %5145 }
 0xf75   : > { %v3573_v62 = vsel %vm2817_vm4, %v5146_v61, 0.0 }
 0xf76   : > { %3574 = vadd.xlane.f32.xlu1 %v3573_v62 }
 0xfce   : > { %v3324_v63 = vpop.xlane.xlu1 %3323 }
 0xfcf   : > { %5147 = vrcp.f32 %v3324_v63 }
 0xfd2   : > { %v3582_v44 = vpop.permute.xlu1 %3581 }
 0xfd9   : > { %v5148_v2 = vpop.eup %5147 }
 0xfda   : > { %v3326_v3 = vmul.f32 %v5148_v2, %v5144_v56  ;;  %v4865_v56 = vpack.c.bf16 %v3867_v55, %v3866_v54 }
 0xfdc   : > { %4736 = vmatmul.mubr.msk.f32.vlgmr.msra.gmra.mrb[22].mxu1 %vm2817_vm4, %v3326_v3  ;;  %v3327_v6 = vadd.f32 %v3326_v3, %v3004_v35  ;;  %v3860_v35 = vld [vmem:[%s6819_s18] sm:$0xff] }
 0xfdd   : > { %4747 = vmatprep.mubr.msk.f32.mxu1 %vm1476_vm2, %v3580_v58  ;;  %4746 = vmatpush3.msra.mxu1 %v2731_v57  ;;  %v4856_v37 = vpack.c.bf16 %v3861_v24, %v3860_v35 }
 0xfde   : > { %4846 = vmatprep.subr.bf16.mxu1 %v5790_v0 }
 0xfe0   : > { %4748 = vmatmul.mubr.msk.f32.vlgmr.msra.gmra.mrb[24].mxu1 %vm1476_vm2, %v3582_v44 }
 0xfe1   : > { %4754 = vmatprep.mubr.msk.f32.mxu1 %vm5791_vm0, %v5792_v1 }
0x1003   : > { %v3575_v4 = vpop.xlane.xlu1 %3574 }
0x1004   : > { %5149 = vrcp.f32 %v3575_v4 }
0x100e   : > { %v5150_v5 = vpop.eup %5149 }
0x100f   : > { %v3577_v7 = vmul.f32 %v5150_v5, %v5146_v61 }
0x1011   : > { %v3578_v8 = vadd.f32 %v3577_v7, %v3327_v6 }
0x1013   : > { %v3736_v9 = vmul.f32 0.25, %v3578_v8 }
0x1015   : > { %3980 = vst.msk [vmem:[%s1274_s20] sm:$0xff] %vm2817_vm4, %v3736_v9 }
0x10af   : > { %v3480_v10 = vpop.f32.mrb[22].mxu1 }
0x10b0   : > { %v3484_v13 = vadd.f32 %v3480_v10, %v3231_v45  ;;  %v4737_v14 = vpop.f32.mrb[23].mxu1 }
0x10b3   : > { %v4749_v15 = vpop.f32.mrb[24].mxu1 }
0x10b4   : > { %v3653_v16 = vpop.f32.mrb[25].mxu1 }
0x10b5   : > { %v4847_v18 = vpack.c.bf16 %v4749_v15, %v3653_v16 }
0x10b7   : > { %4848 = vmatpush3.bf16.msra.mxu1 %v4847_v18 }
0x10b8   : > { %4855 = vmatprep.subr.bf16.mxu1 %v5790_v0 }
0x10ba   : > { %4755 = vmatmul.mubr.msk.f32.vlgmr.msra.gmra.mrb[26].mxu1 %vm2817_vm4, %v3577_v7 }
0x10bb   : > { %4784 = vmatprep.mubr.msk.f32.mxu1 %vm5791_vm0, %v5792_v1  ;;  %4857 = vmatpush3.bf16.msra.mxu1 %v4856_v37 }
0x10bc   : > { %4858 = vmatprep.subr.bf16.mxu1 %v5790_v0 }
0x10bf   : > { %4860 = vmatpush3.bf16.msra.mxu1 %v4859_v39 }
0x10c0   : > { %4861 = vmatprep.subr.bf16.mxu1 %v5790_v0 }
0x10c3   : > { %4863 = vmatpush3.bf16.msra.mxu1 %v4862_v42 }
0x10c4   : > { %4864 = vmatprep.subr.bf16.mxu1 %v5790_v0 }
0x10c7   : > { %4866 = vmatpush3.bf16.msra.mxu1 %v4865_v56 }
0x118d   : > { %v3731_v19 = vpop.f32.mrb[26].mxu1 }
0x118e   : > { %v3735_v21 = vadd.f32 %v3731_v19, %v3484_v13  ;;  %v4756_v22 = vpop.f32.mrb[27].mxu1 }
0x1190   : > { %v3744_v25 = vadd.f32 %v4447_v20, %v3735_v21 }
0x1192   : > { %v3745_v26 = vadd.f32 %v3744_v25, %v6491_v17  ;;  %v3777_v17 = vld [vmem:[#allocation26 + $0x10] sm:$0xff] }
0x1193   : > { %v4853_v34 = vpack.c.bf16 %v3778_v33, %v3777_v17 }
0x1194   : > { %v3748_v12 = vsel %vm1311_vm1, %v3745_v26, 0.0 }
0x1195   : > { %3749 = vadd.xlane.f32.xlu0 %v3748_v12  ;;  %4854 = vmatpush3.bf16.msra.mxu0 %v4853_v34 }
0x1222   : > { %v3750_v27 = vpop.xlane.xlu0 %3749 }
0x1223   : > { %v3751_v28 = vmul.f32 0.03125, %v3750_v27 }
0x1225   : > { %v3752_v29 = vsub.f32 %v3745_v26, %v3751_v28 }
0x1227   : > { %v3753_v30 = vmul.f32 %v3752_v29, %v3752_v29 }
0x1229   : > { %v3754_v1 = vsel %vm1311_vm1, %v3753_v30, 0.0 }
0x122a   : > { %3755 = vadd.xlane.f32.xlu0 %v3754_v1 }
0x12b7   : > { %v3756_v43 = vpop.xlane.xlu0 %3755 }
0x12b8   : > { %v3757_v45 = vmul.f32 0.03125, %v3756_v43 }
0x12ba   : > { %v3758_v47 = vadd.f32 1e-05, %v3757_v45 }
0x12bc   : > { %5151 = vrsqrt.f32 %v3758_v47 }
0x12c6   : > { %v5152_v48 = vpop.eup %5151 }
0x12c7   : > { %v3760_v50 = vmul.f32 %v5152_v48, %v3752_v29 }
0x12c9   : > { %v3767_v52 = vmul.f32 %v4448_v49, %v3760_v50 }
0x12cb   : > { %v3774_v11 = vadd.f32 %v4449_v51, %v3767_v52 }
0x12cd   : > { %4766 = vmatmul.mubr.msk.f32.vlgmr.msra.gmra.mrb[30].mxu0 %vm1311_vm1, %v3774_v11 }
0x13a0   : > { %v3855_v0 = vpop.f32.mrb[30].mxu0 }
0x13a1   : > { %v3856_v57 = vadd.f32 %v4450_v46, %v3855_v0  ;;  %v4767_v58 = vpop.f32.mrb[31].mxu0 }
0x13a3   : > { %v3859_v59 = vmax.f32 %v3856_v57, 0.0 }
0x13a5   : > { %4785 = vmatmul.mubr.msk.f32.vlgmr.msra.gmra.mrb[28].mxu1 %vm3875_vm5, %v3859_v59 }
0x1478   : > { %v3945_v60 = vpop.f32.mrb[28].mxu1 }
0x1479   : > { %v3946_v61 = vadd.f32 %v4452_v53, %v3945_v60  ;;  %v4786_v62 = vpop.f32.mrb[29].mxu1 }
0x147b   : > { %v3949_v63 = vadd.f32 %v3946_v61, %v3774_v11 }
0x147d   : > { %v3952_v2 = vsel %vm1311_vm1, %v3949_v63, 0.0 }
0x147e   : > { %3953 = vadd.xlane.f32.xlu1 %v3952_v2 }
0x150b   : > { %v3954_v3 = vpop.xlane.xlu1 %3953 }
0x150c   : > { %v3955_v44 = vmul.f32 0.03125, %v3954_v3 }
0x150e   : > { %v3956_v4 = vsub.f32 %v3949_v63, %v3955_v44 }
0x1510   : > { %v3957_v5 = vmul.f32 %v3956_v4, %v3956_v4 }
0x1512   : > { %v3958_v6 = vsel %vm1311_vm1, %v3957_v5, 0.0 }
0x1513   : > { %3959 = vadd.xlane.f32.xlu0 %v3958_v6 }
0x1514   : > { %5622 = shalt.err (!%p5619_p9)
}
0x1515   : > { %s5623_s20 = scalar_lea.hbm %s6638_s11, 128  ;;  %s5627_s29 = scalar_lea.hbm %s5965_s17, 256 }
0x1516   : > { %p5624_p7 = scmp.ne.s32.totalorder %s6638_s11, %s5623_s20  ;;  %p5628_p8 = scmp.lt.u32.totalorder %s6638_s11, %s5965_s17 }
0x1517   : > { %p5629_p6 = scmp.lt.u32.totalorder %s5627_s29, %s5623_s20  ;;  %p5631_p4 = scmp.lt.u32.totalorder %s5623_s20, %s6638_s11 }
0x1518   : > { %p5625_p0 = pnand %p5624_p7, %p6824_p3 }
0x1519   : > { %p5630_p5 = por %p5629_p6, %p5628_p8 }
0x151a   : > { %p5626_p13 = pneg %p5625_p0 }
0x151b   : > { %p5632_p10 = por %p5631_p4, %p5630_p5 }
0x151d   : > { %p5633_p12 = pnand %p5632_p10, %p5626_p13 }
0x151f   : > { %5636 = shalt.err (!%p5633_p12)
}
0x1520   : > { %s6825_s6 = sld [smem:[#allocation63_spill]]  ;;  %s6826_s7 = sld [smem:[#allocation64_spill]]  ;;  %v4454_v13 = vld [vmem:[%s5950_s5] ss:$0 sm:$0xff] }
0x1521   : > { %4926 = dma.vmem_to_hbm [thread:$0]  (%p6824_p3), %s4014_s25, 128, %s6638_s11, %s3987_s22  }
0x1522   : > { %s1267_s0 = scalar_lea.vmem [#allocation28], %s6318_s28  ;;  %s3982_s11 = scalar_lea.sflag [#allocation4], %s6315_s4 }
0x1523   : > { %s4000_s1 = sshll.u32 %s1267_s0, 4  ;;  %s5801_s28 = smov [#allocation28]   ;;  %s6664_s1 = int_to_ptr.vmem [resolvable:$true] %s4000_s1 }
0x1524   : > { %s5637_s25 = scalar_lea.vmem %s6664_s1, 128  ;;  %s5641_s22 = sshll.u32 %s5801_s28, 4  ;;  %s5642_s22 = int_to_ptr.vmem [resolvable:$false] %s5641_s22 }
0x1525   : > { %p5638_p11 = scmp.ne.s32.totalorder %s6664_s1, %s5637_s25  ;;  %s5643_s24 = scalar_lea.vmem %s5642_s22, 256 }
0x1526   : > { %v4455_v15 = vld [vmem:[%s6825_s6] ss:$0 sm:$0xff]  ;;  %s6662_s15 = scalar_lea.hbm %s6826_s7, %s4458_s16  ;;  %p5644_p9 = scmp.lt.s32.totalorder %s6664_s1, %s5642_s22 }
0x1527   : > { %p5639_p2 = pnand %p5638_p11, %p6824_p3  ;;  %p5645_p7 = scmp.lt.s32.totalorder %s5643_s24, %s5637_s25 }
0x1529   : > { %p5640_p1 = pneg %p5639_p2  ;;  %p5646_p0 = por %p5645_p7, %p5644_p9 }
0x152b   : > { %p5647_p13 = pnand %p5646_p0, %p5640_p1 }
0x15a0   : > { %v3960_v7 = vpop.xlane.xlu0 %3959 }
0x15a1   : > { %v3961_v8 = vmul.f32 0.03125, %v3960_v7 }
0x15a3   : > { %v3962_v9 = vadd.f32 1e-05, %v3961_v8 }
0x15a5   : > { %5153 = vrsqrt.f32 %v3962_v9 }
0x15af   : > { %v5154_v10 = vpop.eup %5153 }
0x15b0   : > { %v3964_v14 = vmul.f32 %v5154_v10, %v3956_v4 }
0x15b2   : > { %v3971_v16 = vmul.f32 %v4454_v13, %v3964_v14 }
0x15b4   : > { %v3978_v18 = vadd.f32 %v4455_v15, %v3971_v16 }
0x15b6   : > { %3979 = vst.msk [vmem:[%s1267_s0] sm:$0xff] %vm1311_vm1, %v3978_v18 }
0x15b7   : > { %5650 = shalt.err (!%p5647_p13)
}
0x15b8   : > { %s5651_s2 = scalar_lea.hbm %s6662_s15, 128  ;;  %s5655_s4 = scalar_lea.hbm %s6826_s7, 256 }
0x15b9   : > { %p5652_p8 = scmp.ne.s32.totalorder %s6662_s15, %s5651_s2  ;;  %p5656_p4 = scmp.lt.u32.totalorder %s6662_s15, %s6826_s7 }
0x15ba   : > { %p5657_p10 = scmp.lt.u32.totalorder %s5655_s4, %s5651_s2  ;;  %p5659_p11 = scmp.lt.u32.totalorder %s5651_s2, %s6662_s15 }
0x15bb   : > { %p5653_p6 = pnand %p5652_p8, %p6824_p3 }
0x15bc   : > { %p5658_p12 = por %p5657_p10, %p5656_p4 }
0x15bd   : > { %p5654_p5 = pneg %p5653_p6 }
0x15be   : > { %p5660_p2 = por %p5659_p11, %p5658_p12 }
0x15c0   : > { %p5661_p1 = pnand %p5660_p2, %p5654_p5 }
0x15c2   : > { %5664 = shalt.err (!%p5661_p1)
}
0x15c3   : > { %4925 = dma.vmem_to_hbm [thread:$0]  (%p6824_p3), %s6664_s1, 128, %s6662_s15, %s3982_s11  }
0x15c4 PF: > { %s6827_s16 = sld [smem:[#allocation65_spill]]  ;;  %s6828_s20 = sld [smem:[#allocation69_spill]] }
0x15c5   : > { %p6830_p7 = scmp.ge.s32.totalorder %s5739_s26, 2 }
0x15ca   : > { %s4025_s29 = sand.u32 1, %s6827_s16   ;;  %p6829_p9 = scmp.ne.s32.totalorder %s6828_s20, 0 }
0x15cb   : > { %s4026_s6 = scalar_lea.sflag [#allocation4], %s4025_s29 }
0x15cc   : > { %p4980_p0 = pnand %p6830_p7, %p6829_p9 }
0x15ce   : > { %5718 = dma.done.wait (!%p4980_p0), %s4026_s6, 128  }
0x15cf   : > { %5720 = vsyncadd (!%p4980_p0), %s4026_s6, 4294967168  ;;  %s4035_s0 = scalar_lea.sflag [#allocation30], %s4025_s29 }
0x15d0   : > { %5722 = dma.done.wait (!%p4980_p0), %s4035_s0, 128  }
0x15d1   : > { %5724 = vsyncadd (!%p4980_p0), %s4035_s0, 4294967168  ;;  %s6831_s26 = sld [smem:[#allocation67_spill]]  ;;  %s6832_s8 = sld [smem:[#allocation66_spill]] }
0x15d2   : > { %s6833_s0 = sld [smem:[#allocation68_spill]]  ;;  %s6834_s22 = smov %s5731_s23 }
0x15d7   : > { %p90_p3 = scmp.ge.s32.totalorder %s6831_s26, 4   ;;  %s6835_s23 = smov %s6832_s8 }
0x15d9   :  { %92 = sbr.rel (!%p90_p3) target bundleno = 74 (0x4a), region = 318 }
0x15e0   :  { %4040 = vsyncpa [#allocation3], 1 }
0x15e1   :  { %4042 = vsyncpa [#allocation3 + $0x1], 1 }
0x15e2   :  { %4043 = vsyncpa [#allocation6], 1 }
0x15e3   :  { %4045 = vsyncpa [#allocation6 + $0x1], 1 }
0x15e4   :  { %4046 = vsyncpa [#allocation9], 1 }
0x15e5   :  { %4047 = vsyncpa [#allocation12], 1 }
0x15e6   :  { %4048 = vsyncpa [#allocation15], 1 }
0x15e7   :  { %4049 = vsyncpa [#allocation18], 1 }
0x15e8   :  { %4050 = vsyncpa [#allocation21], 1 }
0x15e9   :  { %4051 = vsyncpa [#allocation24], 1 }
0x15ea   :  { %4052 = vsyncpa [#allocation27], 1 }
0x15eb   :  { %4053 = vsyncpa [#allocation4], 1 }
0x15ec   :  { %4055 = vsyncpa [#allocation4 + $0x1], 1 }
0x15ed   :  { %4056 = vsyncpa [#allocation30], 1 }
0x15ee   :  { %4058 = vsyncpa [#allocation30 + $0x1], 1 }

</bundles_post_ra>
